<compile_context>
chip_gen: v5e
topology: v5e:2x2
jax: 0.10.0
libtpu: 0.0.40
codegen_flags: <defaults>
</compile_context>

<pallas_src>
import jax
import jax.numpy as jnp
from jax.experimental import pallas as pl
from jax.experimental.pallas import tpu as pltpu

# ----------------- tiny Qwen2-like config -----------------
HIDDEN = 64
N_HEADS = 4
N_KV_HEADS = 2
HEAD_DIM = HIDDEN // N_HEADS            # 16
GROUPS = N_HEADS // N_KV_HEADS          # 2
INTER = 128
N_LAYERS = 2
VOCAB = 128
RMS_EPS = 1e-6
ROPE_THETA = 10000.0
OUT_DIM = 32                            # final "linear" embedding head dim
BATCH = 2
MAX_S = 8
SCALE = HEAD_DIM ** -0.5
DTYPE = jnp.float32

Q_SIZE = N_HEADS * HEAD_DIM             # 64
KV_SIZE = N_KV_HEADS * HEAD_DIM         # 32
D2 = HEAD_DIM // 2                      # 8


# ----------------- fused Pallas kernel (one grid step == one sequence) -----------------
def _fused_forward_kernel(h_ref, cos_ref, sin_ref,
                          ln1_ref, qkvw_ref, qkvb_ref, ow_ref,
                          ln2_ref, guw_ref, dw_ref,
                          normw_ref, outw_ref, outb_ref,
                          o_ref):
    S = MAX_S
    h = h_ref[0].astype(jnp.float32)        # [S, H]
    cos = cos_ref[0].astype(jnp.float32)    # [S, D/2]
    sin = sin_ref[0].astype(jnp.float32)    # [S, D/2]

    # causal mask (shared across layers / heads)
    row = jax.lax.broadcasted_iota(jnp.int32, (S, S), 0)
    col = jax.lax.broadcasted_iota(jnp.int32, (S, S), 1)
    causal = col <= row

    def rms(x, w):                           # x: [S,H] f32, w: [1,H]
        var = jnp.mean(x * x, axis=-1, keepdims=True)
        return x * jax.lax.rsqrt(var + RMS_EPS) * w

    res = jnp.zeros_like(h)                  # residual=None case for first layer

    for li in range(N_LAYERS):               # static unroll (N_LAYERS = 2)
        # ---- input_layernorm (+ residual add) ----
        x = h + res
        res = x
        normed = rms(x, ln1_ref[li])

        # ---- fused qkv projection (single matmul + bias) ----
        qkv = jnp.dot(normed, qkvw_ref[li],
                      preferred_element_type=jnp.float32) + qkvb_ref[li]   # [S, Q+2KV]

        o_w = ow_ref[li]                     # [Q, H] (pre-transposed)
        attn_out = jnp.zeros((S, HIDDEN), jnp.float32)

        # ---- causal GQA attention; K/V of each group loaded once; o_proj fused ----
        for kvh in range(N_KV_HEADS):
            k_sl = qkv[:, Q_SIZE + kvh * HEAD_DIM: Q_SIZE + (kvh + 1) * HEAD_DIM]
            v_sl = qkv[:, Q_SIZE + KV_SIZE + kvh * HEAD_DIM:
                          Q_SIZE + KV_SIZE + (kvh + 1) * HEAD_DIM]
            k1, k2 = k_sl[:, :D2], k_sl[:, D2:]
            kr1 = k1 * cos - k2 * sin        # rotate-half RoPE on K (half-split form)
            kr2 = k2 * cos + k1 * sin
            for g in range(GROUPS):
                hh = kvh * GROUPS + g
                q_sl = qkv[:, hh * HEAD_DIM: (hh + 1) * HEAD_DIM]
                q1, q2 = q_sl[:, :D2], q_sl[:, D2:]
                qr1 = (q1 * cos - q2 * sin) * SCALE   # fold softmax scale into q
                qr2 = (q2 * cos + q1 * sin) * SCALE
                s = (jnp.dot(qr1, kr1.T, preferred_element_type=jnp.float32)
                     + jnp.dot(qr2, kr2.T, preferred_element_type=jnp.float32))
                s = jnp.where(causal, s, -1e30)
                m = jnp.max(s, axis=-1, keepdims=True)
                e = jnp.exp(s - m)
                p = e * pl.reciprocal(jnp.sum(e, axis=-1, keepdims=True), approx=True)
                oh = jnp.dot(p, v_sl, preferred_element_type=jnp.float32)   # [S, D]
                # o_proj contribution of this head (no bias)
                attn_out = attn_out + jnp.dot(
                    oh, o_w[hh * HEAD_DIM: (hh + 1) * HEAD_DIM, :],
                    preferred_element_type=jnp.float32)

        # ---- post_attention_layernorm (+ residual add) ----
        x = attn_out + res
        res = x
        normed2 = rms(x, ln2_ref[li])

        # ---- SwiGLU MLP: gate & up fused into one [H, 2I] matmul ----
        gu = jnp.dot(normed2, guw_ref[li], preferred_element_type=jnp.float32)  # [S, 2I]
        gate = gu[:, :INTER]
        up = gu[:, INTER:]
        h = jnp.dot(gate * jax.nn.sigmoid(gate) * up, dw_ref[li],
                    preferred_element_type=jnp.float32)                          # [S, H]

    # ---- final model.norm + mean-pool over sequence + output head ----
    x = h + res
    normed = rms(x, normw_ref[...])
    pooled = jnp.mean(normed, axis=0, keepdims=True)                # [1, H]
    out = jnp.dot(pooled, outw_ref[...],
                  preferred_element_type=jnp.float32) + outb_ref[...]   # [1, E]
    o_ref[0] = out.astype(o_ref.dtype)


def fused_forward(hidden0, cos, sin, w):
    """hidden0: [B, S, H]; cos/sin: [B, S, D/2]; w: dict of stacked, pre-transposed weights."""
    B, S, H = hidden0.shape
    d2 = cos.shape[-1]
    const3 = lambda b: (0, 0, 0)
    const2 = lambda b: (0, 0)
    out = pl.pallas_call(
        _fused_forward_kernel,
        out_shape=jax.ShapeDtypeStruct((B, 1, OUT_DIM), hidden0.dtype),
        grid=(B,),
        in_specs=[
            pl.BlockSpec((1, S, H), lambda b: (b, 0, 0)),
            pl.BlockSpec((1, S, d2), lambda b: (b, 0, 0)),
            pl.BlockSpec((1, S, d2), lambda b: (b, 0, 0)),
            pl.BlockSpec(w["ln1"].shape, const3),
            pl.BlockSpec(w["qkv_w"].shape, const3),
            pl.BlockSpec(w["qkv_b"].shape, const3),
            pl.BlockSpec(w["o_w"].shape, const3),
            pl.BlockSpec(w["ln2"].shape, const3),
            pl.BlockSpec(w["gu_w"].shape, const3),
            pl.BlockSpec(w["down_w"].shape, const3),
            pl.BlockSpec(w["norm_w"].shape, const2),
            pl.BlockSpec(w["out_w"].shape, const2),
            pl.BlockSpec(w["out_b"].shape, const2),
        ],
        out_specs=pl.BlockSpec((1, 1, OUT_DIM), lambda b: (b, 0, 0)),
        compiler_params=pltpu.CompilerParams(
            dimension_semantics=("parallel",)),   # lets v7x split batch across its 2 TCs
    )(hidden0, cos, sin,
      w["ln1"], w["qkv_w"], w["qkv_b"], w["o_w"],
      w["ln2"], w["gu_w"], w["down_w"],
      w["norm_w"], w["out_w"], w["out_b"])
    return out.reshape(B, OUT_DIM)


# ----------------- params (PyTorch layout) + one-time prep -----------------
def init_params(key):
    def nrm(k, shape, scale=0.02):
        return scale * jax.random.normal(k, shape, dtype=DTYPE)

    keys = jax.random.split(key, 4 + N_LAYERS)
    params = {
        "embed": nrm(keys[0], (VOCAB, HIDDEN)),
        "norm_w": jnp.ones((HIDDEN,), DTYPE),
        "out_w": nrm(keys[1], (OUT_DIM, HIDDEN)),
        "out_b": nrm(keys[2], (OUT_DIM,)),
        "layers": [],
    }
    for li in range(N_LAYERS):
        ks = jax.random.split(keys[4 + li], 8)
        params["layers"].append({
            "ln1_w": jnp.ones((HIDDEN,), DTYPE),
            "qkv_w": nrm(ks[0], (Q_SIZE + 2 * KV_SIZE, HIDDEN)),   # [out, in]
            "qkv_b": nrm(ks[1], (Q_SIZE + 2 * KV_SIZE,)),
            "o_w": nrm(ks[2], (HIDDEN, Q_SIZE)),
            "ln2_w": jnp.ones((HIDDEN,), DTYPE),
            "gate_w": nrm(ks[3], (INTER, HIDDEN)),
            "up_w": nrm(ks[4], (INTER, HIDDEN)),
            "down_w": nrm(ks[5], (HIDDEN, INTER)),
        })
    return params


def prepare_weights(params):
    """Done ONCE: transpose to [in, out], fuse gate+up, stack layers on a leading axis."""
    def stack(fn):
        return jnp.stack([fn(l) for l in params["layers"]], axis=0)
    return {
        "ln1": stack(lambda l: l["ln1_w"].reshape(1, HIDDEN)),                   # [L,1,H]
        "qkv_w": stack(lambda l: l["qkv_w"].T),                                  # [L,H,Q+2KV]
        "qkv_b": stack(lambda l: l["qkv_b"].reshape(1, -1)),                     # [L,1,Q+2KV]
        "o_w": stack(lambda l: l["o_w"].T),                                      # [L,Q,H]
        "ln2": stack(lambda l: l["ln2_w"].reshape(1, HIDDEN)),                   # [L,1,H]
        "gu_w": stack(lambda l: jnp.concatenate([l["gate_w"], l["up_w"]], 0).T), # [L,H,2I]
        "down_w": stack(lambda l: l["down_w"].T),                                # [L,I,H]
        "norm_w": params["norm_w"].reshape(1, HIDDEN),                           # [1,H]
        "out_w": params["out_w"].T,                                              # [H,E]
        "out_b": params["out_b"].reshape(1, OUT_DIM),                            # [1,E]
    }


# ----------------- glue (one-time ops only) -----------------
def forward(embed, stacked, input_ids, position_ids):
    hidden = jnp.take(embed, input_ids, axis=0)                     # [T, H] token embedding

    inv_freq = 1.0 / (ROPE_THETA ** (jnp.arange(0, HEAD_DIM, 2, dtype=jnp.float32)
                                     / HEAD_DIM))
    freqs = position_ids.astype(jnp.float32)[:, None] * inv_freq[None, :]
    cos = jnp.cos(freqs).astype(DTYPE).reshape(BATCH, MAX_S, D2)
    sin = jnp.sin(freqs).astype(DTYPE).reshape(BATCH, MAX_S, D2)

    hidden = hidden.reshape(BATCH, MAX_S, HIDDEN)
    return fused_forward(hidden, cos, sin, stacked)                 # [B, OUT_DIM]


forward_jit = jax.jit(forward)


if __name__ == "__main__":
    key = jax.random.PRNGKey(0)
    pkey, ikey = jax.random.split(key)
    params = init_params(pkey)
    stacked = prepare_weights(params)

    input_ids = jax.random.randint(ikey, (BATCH * MAX_S,), 0, VOCAB, dtype=jnp.int32)
    position_ids = jnp.tile(jnp.arange(MAX_S, dtype=jnp.int32), BATCH)

    embeddings = forward_jit(params["embed"], stacked, input_ids, position_ids)
    jax.block_until_ready(embeddings)
    assert embeddings.shape == (BATCH, OUT_DIM)
    assert bool(jnp.all(jnp.isfinite(embeddings)))
    print("KERNEL_OK")
</pallas_src>

<mosaic_0001>
module attributes {stable_mosaic.version = 11 : i64} {
  func.func @_fused_forward_kernel(%arg0: i32, %arg1: memref<1x8x64xf32, #tpu.memory_space<vmem>>, %arg2: memref<1x8x8xf32, #tpu.memory_space<vmem>>, %arg3: memref<1x8x8xf32, #tpu.memory_space<vmem>>, %arg4: memref<2x1x64xf32, #tpu.memory_space<vmem>>, %arg5: memref<2x64x128xf32, #tpu.memory_space<vmem>>, %arg6: memref<2x1x128xf32, #tpu.memory_space<vmem>>, %arg7: memref<2x64x64xf32, #tpu.memory_space<vmem>>, %arg8: memref<2x1x64xf32, #tpu.memory_space<vmem>>, %arg9: memref<2x64x256xf32, #tpu.memory_space<vmem>>, %arg10: memref<2x128x64xf32, #tpu.memory_space<vmem>>, %arg11: memref<1x64xf32, #tpu.memory_space<vmem>>, %arg12: memref<64x32xf32, #tpu.memory_space<vmem>>, %arg13: memref<1x32xf32, #tpu.memory_space<vmem>>, %arg14: memref<1x1x32xf32, #tpu.memory_space<vmem>>) attributes {dimension_semantics = [#tpu.dimension_semantics<parallel>], iteration_bounds = array<i64: 2>, scalar_prefetch = 0 : i64, scratch_operands = 0 : i64, tpu.core_type = #tpu.core_type<tc>, window_params = [{transform_indices = @transform_0, window_bounds = array<i64: 1, 8, 64>}, {transform_indices = @transform_1, window_bounds = array<i64: 1, 8, 8>}, {transform_indices = @transform_2, window_bounds = array<i64: 1, 8, 8>}, {pipeline_mode = #tpu.pipeline_mode<synchronous>, transform_indices = @transform_3, window_bounds = array<i64: 2, 1, 64>}, {pipeline_mode = #tpu.pipeline_mode<synchronous>, transform_indices = @transform_4, window_bounds = array<i64: 2, 64, 128>}, {pipeline_mode = #tpu.pipeline_mode<synchronous>, transform_indices = @transform_5, window_bounds = array<i64: 2, 1, 128>}, {pipeline_mode = #tpu.pipeline_mode<synchronous>, transform_indices = @transform_6, window_bounds = array<i64: 2, 64, 64>}, {pipeline_mode = #tpu.pipeline_mode<synchronous>, transform_indices = @transform_7, window_bounds = array<i64: 2, 1, 64>}, {pipeline_mode = #tpu.pipeline_mode<synchronous>, transform_indices = @transform_8, window_bounds = array<i64: 2, 64, 256>}, {pipeline_mode = #tpu.pipeline_mode<synchronous>, transform_indices = @transform_9, window_bounds = array<i64: 2, 128, 64>}, {pipeline_mode = #tpu.pipeline_mode<synchronous>, transform_indices = @transform_10, window_bounds = array<i64: 1, 64>}, {pipeline_mode = #tpu.pipeline_mode<synchronous>, transform_indices = @transform_11, window_bounds = array<i64: 64, 32>}, {pipeline_mode = #tpu.pipeline_mode<synchronous>, transform_indices = @transform_12, window_bounds = array<i64: 1, 32>}, {transform_indices = @transform_13, window_bounds = array<i64: 1, 1, 32>}]} {
    %c0 = arith.constant 0 : index
    %c0_0 = arith.constant 0 : index
    %c0_1 = arith.constant 0 : index
    %0 = vector.load %arg1[%c0, %c0_0, %c0_1] : memref<1x8x64xf32, #tpu.memory_space<vmem>>, vector<1x8x64xf32>
    %1 = vector.shape_cast %0 : vector<1x8x64xf32> to vector<8x64xf32>
    %c0_2 = arith.constant 0 : index
    %c0_3 = arith.constant 0 : index
    %c0_4 = arith.constant 0 : index
    %2 = vector.load %arg2[%c0_2, %c0_3, %c0_4] : memref<1x8x8xf32, #tpu.memory_space<vmem>>, vector<1x8x8xf32>
    %3 = vector.shape_cast %2 : vector<1x8x8xf32> to vector<8x8xf32>
    %c0_5 = arith.constant 0 : index
    %c0_6 = arith.constant 0 : index
    %c0_7 = arith.constant 0 : index
    %4 = vector.load %arg3[%c0_5, %c0_6, %c0_7] : memref<1x8x8xf32, #tpu.memory_space<vmem>>, vector<1x8x8xf32>
    %5 = vector.shape_cast %4 : vector<1x8x8xf32> to vector<8x8xf32>
    %6 = tpu.iota {dimensions = array<i32: 0>} : vector<8x8xi32>
    %7 = tpu.iota {dimensions = array<i32: 1>} : vector<8x8xi32>
    %8 = arith.cmpi sle, %7, %6 : vector<8x8xi32>
    %cst = arith.constant 0.000000e+00 : f32
    %9 = vector.broadcast %cst : f32 to vector<8x64xf32>
    %10 = arith.addf %1, %9 : vector<8x64xf32>
    %c0_8 = arith.constant 0 : index
    %c0_9 = arith.constant 0 : index
    %c0_10 = arith.constant 0 : index
    %11 = vector.load %arg4[%c0_8, %c0_9, %c0_10] : memref<2x1x64xf32, #tpu.memory_space<vmem>>, vector<1x1x64xf32>
    %12 = vector.shape_cast %11 : vector<1x1x64xf32> to vector<1x64xf32>
    %13 = arith.mulf %10, %10 : vector<8x64xf32>
    %cst_11 = arith.constant dense<0.000000e+00> : vector<8xf32>
    %14 = vector.multi_reduction <add>, %13, %cst_11 [1] : vector<8x64xf32> to vector<8xf32>
    %15 = vector.shape_cast %14 : vector<8xf32> to vector<8x1xf32>
    %cst_12 = arith.constant 6.400000e+01 : f32
    %16 = vector.broadcast %cst_12 : f32 to vector<8x1xf32>
    %17 = arith.divf %15, %16 : vector<8x1xf32>
    %cst_13 = arith.constant 9.99999997E-7 : f32
    %18 = vector.broadcast %cst_13 : f32 to vector<8x1xf32>
    %19 = arith.addf %17, %18 : vector<8x1xf32>
    %20 = math.rsqrt %19 : vector<8x1xf32>
    %21 = vector.broadcast %20 : vector<8x1xf32> to vector<8x64xf32>
    %22 = arith.mulf %10, %21 : vector<8x64xf32>
    %23 = vector.broadcast %12 : vector<1x64xf32> to vector<8x64xf32>
    %24 = arith.mulf %22, %23 : vector<8x64xf32>
    %c0_14 = arith.constant 0 : index
    %c0_15 = arith.constant 0 : index
    %c0_16 = arith.constant 0 : index
    %25 = vector.load %arg5[%c0_14, %c0_15, %c0_16] : memref<2x64x128xf32, #tpu.memory_space<vmem>>, vector<1x64x128xf32>
    %26 = vector.shape_cast %25 : vector<1x64x128xf32> to vector<64x128xf32>
    %cst_17 = arith.constant dense<0.000000e+00> : vector<8x128xf32>
    %27 = tpu.matmul %24, %26, %cst_17 {dimension_numbers = #tpu.dot_dimension_numbers<[1], [0], [0], [1], [0, 0, 1, 1], [], []>} : vector<8x64xf32>, vector<64x128xf32>, vector<8x128xf32> -> vector<8x128xf32>
    %c0_18 = arith.constant 0 : index
    %c0_19 = arith.constant 0 : index
    %c0_20 = arith.constant 0 : index
    %28 = vector.load %arg6[%c0_18, %c0_19, %c0_20] : memref<2x1x128xf32, #tpu.memory_space<vmem>>, vector<1x1x128xf32>
    %29 = vector.shape_cast %28 : vector<1x1x128xf32> to vector<1x128xf32>
    %30 = vector.broadcast %29 : vector<1x128xf32> to vector<8x128xf32>
    %31 = arith.addf %27, %30 : vector<8x128xf32>
    %c0_21 = arith.constant 0 : index
    %c0_22 = arith.constant 0 : index
    %c0_23 = arith.constant 0 : index
    %32 = vector.load %arg7[%c0_21, %c0_22, %c0_23] : memref<2x64x64xf32, #tpu.memory_space<vmem>>, vector<1x64x64xf32>
    %33 = vector.shape_cast %32 : vector<1x64x64xf32> to vector<64x64xf32>
    %cst_24 = arith.constant 0.000000e+00 : f32
    %34 = vector.broadcast %cst_24 : f32 to vector<8x64xf32>
    %35 = vector.extract_strided_slice %31 {offsets = [0, 64], sizes = [8, 16], strides = [1, 1]} : vector<8x128xf32> to vector<8x16xf32>
    %36 = vector.extract_strided_slice %31 {offsets = [0, 96], sizes = [8, 16], strides = [1, 1]} : vector<8x128xf32> to vector<8x16xf32>
    %37 = vector.extract_strided_slice %35 {offsets = [0, 0], sizes = [8, 8], strides = [1, 1]} : vector<8x16xf32> to vector<8x8xf32>
    %38 = vector.extract_strided_slice %35 {offsets = [0, 8], sizes = [8, 8], strides = [1, 1]} : vector<8x16xf32> to vector<8x8xf32>
    %39 = arith.mulf %37, %3 : vector<8x8xf32>
    %40 = arith.mulf %38, %5 : vector<8x8xf32>
    %41 = arith.subf %39, %40 : vector<8x8xf32>
    %42 = arith.mulf %38, %3 : vector<8x8xf32>
    %43 = arith.mulf %37, %5 : vector<8x8xf32>
    %44 = arith.addf %42, %43 : vector<8x8xf32>
    %45 = vector.extract_strided_slice %31 {offsets = [0, 0], sizes = [8, 16], strides = [1, 1]} : vector<8x128xf32> to vector<8x16xf32>
    %46 = vector.extract_strided_slice %45 {offsets = [0, 0], sizes = [8, 8], strides = [1, 1]} : vector<8x16xf32> to vector<8x8xf32>
    %47 = vector.extract_strided_slice %45 {offsets = [0, 8], sizes = [8, 8], strides = [1, 1]} : vector<8x16xf32> to vector<8x8xf32>
    %48 = arith.mulf %46, %3 : vector<8x8xf32>
    %49 = arith.mulf %47, %5 : vector<8x8xf32>
    %50 = arith.subf %48, %49 : vector<8x8xf32>
    %cst_25 = arith.constant 2.500000e-01 : f32
    %51 = vector.broadcast %cst_25 : f32 to vector<8x8xf32>
    %52 = arith.mulf %50, %51 : vector<8x8xf32>
    %53 = arith.mulf %47, %3 : vector<8x8xf32>
    %54 = arith.mulf %46, %5 : vector<8x8xf32>
    %55 = arith.addf %53, %54 : vector<8x8xf32>
    %cst_26 = arith.constant 2.500000e-01 : f32
    %56 = vector.broadcast %cst_26 : f32 to vector<8x8xf32>
    %57 = arith.mulf %55, %56 : vector<8x8xf32>
    %58 = tpu.transpose %41, [1, 0] : vector<8x8xf32> -> vector<8x8xf32>
    %cst_27 = arith.constant dense<0.000000e+00> : vector<8x8xf32>
    %59 = tpu.matmul %52, %58, %cst_27 {dimension_numbers = #tpu.dot_dimension_numbers<[1], [0], [0], [1], [0, 0, 1, 1], [], []>} : vector<8x8xf32>, vector<8x8xf32>, vector<8x8xf32> -> vector<8x8xf32>
    %60 = tpu.transpose %44, [1, 0] : vector<8x8xf32> -> vector<8x8xf32>
    %cst_28 = arith.constant dense<0.000000e+00> : vector<8x8xf32>
    %61 = tpu.matmul %57, %60, %cst_28 {dimension_numbers = #tpu.dot_dimension_numbers<[1], [0], [0], [1], [0, 0, 1, 1], [], []>} : vector<8x8xf32>, vector<8x8xf32>, vector<8x8xf32> -> vector<8x8xf32>
    %62 = arith.addf %59, %61 : vector<8x8xf32>
    %cst_29 = arith.constant -1.000000e+30 : f32
    %63 = vector.broadcast %cst_29 : f32 to vector<8x8xf32>
    %64 = arith.select %8, %62, %63 : vector<8x8xi1>, vector<8x8xf32>
    %cst_30 = arith.constant dense<0xFF800000> : vector<8xf32>
    %65 = vector.multi_reduction <maximumf>, %64, %cst_30 [1] : vector<8x8xf32> to vector<8xf32>
    %66 = vector.shape_cast %65 : vector<8xf32> to vector<8x1xf32>
    %67 = vector.broadcast %66 : vector<8x1xf32> to vector<8x8xf32>
    %68 = arith.subf %64, %67 : vector<8x8xf32>
    %69 = math.exp %68 : vector<8x8xf32>
    %cst_31 = arith.constant dense<0.000000e+00> : vector<8xf32>
    %70 = vector.multi_reduction <add>, %69, %cst_31 [1] : vector<8x8xf32> to vector<8xf32>
    %71 = vector.shape_cast %70 : vector<8xf32> to vector<8x1xf32>
    %72 = tpu.reciprocal %71 {approx = true} : vector<8x1xf32> -> vector<8x1xf32>
    %73 = vector.broadcast %72 : vector<8x1xf32> to vector<8x8xf32>
    %74 = arith.mulf %69, %73 : vector<8x8xf32>
    %cst_32 = arith.constant dense<0.000000e+00> : vector<8x16xf32>
    %75 = tpu.matmul %74, %36, %cst_32 {dimension_numbers = #tpu.dot_dimension_numbers<[1], [0], [0], [1], [0, 0, 1, 1], [], []>} : vector<8x8xf32>, vector<8x16xf32>, vector<8x16xf32> -> vector<8x16xf32>
    %76 = vector.extract_strided_slice %33 {offsets = [0, 0], sizes = [16, 64], strides = [1, 1]} : vector<64x64xf32> to vector<16x64xf32>
    %cst_33 = arith.constant dense<0.000000e+00> : vector<8x64xf32>
    %77 = tpu.matmul %75, %76, %cst_33 {dimension_numbers = #tpu.dot_dimension_numbers<[1], [0], [0], [1], [0, 0, 1, 1], [], []>} : vector<8x16xf32>, vector<16x64xf32>, vector<8x64xf32> -> vector<8x64xf32>
    %78 = arith.addf %34, %77 : vector<8x64xf32>
    %79 = vector.extract_strided_slice %31 {offsets = [0, 16], sizes = [8, 16], strides = [1, 1]} : vector<8x128xf32> to vector<8x16xf32>
    %80 = vector.extract_strided_slice %79 {offsets = [0, 0], sizes = [8, 8], strides = [1, 1]} : vector<8x16xf32> to vector<8x8xf32>
    %81 = vector.extract_strided_slice %79 {offsets = [0, 8], sizes = [8, 8], strides = [1, 1]} : vector<8x16xf32> to vector<8x8xf32>
    %82 = arith.mulf %80, %3 : vector<8x8xf32>
    %83 = arith.mulf %81, %5 : vector<8x8xf32>
    %84 = arith.subf %82, %83 : vector<8x8xf32>
    %cst_34 = arith.constant 2.500000e-01 : f32
    %85 = vector.broadcast %cst_34 : f32 to vector<8x8xf32>
    %86 = arith.mulf %84, %85 : vector<8x8xf32>
    %87 = arith.mulf %81, %3 : vector<8x8xf32>
    %88 = arith.mulf %80, %5 : vector<8x8xf32>
    %89 = arith.addf %87, %88 : vector<8x8xf32>
    %cst_35 = arith.constant 2.500000e-01 : f32
    %90 = vector.broadcast %cst_35 : f32 to vector<8x8xf32>
    %91 = arith.mulf %89, %90 : vector<8x8xf32>
    %92 = tpu.transpose %41, [1, 0] : vector<8x8xf32> -> vector<8x8xf32>
    %cst_36 = arith.constant dense<0.000000e+00> : vector<8x8xf32>
    %93 = tpu.matmul %86, %92, %cst_36 {dimension_numbers = #tpu.dot_dimension_numbers<[1], [0], [0], [1], [0, 0, 1, 1], [], []>} : vector<8x8xf32>, vector<8x8xf32>, vector<8x8xf32> -> vector<8x8xf32>
    %94 = tpu.transpose %44, [1, 0] : vector<8x8xf32> -> vector<8x8xf32>
    %cst_37 = arith.constant dense<0.000000e+00> : vector<8x8xf32>
    %95 = tpu.matmul %91, %94, %cst_37 {dimension_numbers = #tpu.dot_dimension_numbers<[1], [0], [0], [1], [0, 0, 1, 1], [], []>} : vector<8x8xf32>, vector<8x8xf32>, vector<8x8xf32> -> vector<8x8xf32>
    %96 = arith.addf %93, %95 : vector<8x8xf32>
    %cst_38 = arith.constant -1.000000e+30 : f32
    %97 = vector.broadcast %cst_38 : f32 to vector<8x8xf32>
    %98 = arith.select %8, %96, %97 : vector<8x8xi1>, vector<8x8xf32>
    %cst_39 = arith.constant dense<0xFF800000> : vector<8xf32>
    %99 = vector.multi_reduction <maximumf>, %98, %cst_39 [1] : vector<8x8xf32> to vector<8xf32>
    %100 = vector.shape_cast %99 : vector<8xf32> to vector<8x1xf32>
    %101 = vector.broadcast %100 : vector<8x1xf32> to vector<8x8xf32>
    %102 = arith.subf %98, %101 : vector<8x8xf32>
    %103 = math.exp %102 : vector<8x8xf32>
    %cst_40 = arith.constant dense<0.000000e+00> : vector<8xf32>
    %104 = vector.multi_reduction <add>, %103, %cst_40 [1] : vector<8x8xf32> to vector<8xf32>
    %105 = vector.shape_cast %104 : vector<8xf32> to vector<8x1xf32>
    %106 = tpu.reciprocal %105 {approx = true} : vector<8x1xf32> -> vector<8x1xf32>
    %107 = vector.broadcast %106 : vector<8x1xf32> to vector<8x8xf32>
    %108 = arith.mulf %103, %107 : vector<8x8xf32>
    %cst_41 = arith.constant dense<0.000000e+00> : vector<8x16xf32>
    %109 = tpu.matmul %108, %36, %cst_41 {dimension_numbers = #tpu.dot_dimension_numbers<[1], [0], [0], [1], [0, 0, 1, 1], [], []>} : vector<8x8xf32>, vector<8x16xf32>, vector<8x16xf32> -> vector<8x16xf32>
    %110 = vector.extract_strided_slice %33 {offsets = [16, 0], sizes = [16, 64], strides = [1, 1]} : vector<64x64xf32> to vector<16x64xf32>
    %cst_42 = arith.constant dense<0.000000e+00> : vector<8x64xf32>
    %111 = tpu.matmul %109, %110, %cst_42 {dimension_numbers = #tpu.dot_dimension_numbers<[1], [0], [0], [1], [0, 0, 1, 1], [], []>} : vector<8x16xf32>, vector<16x64xf32>, vector<8x64xf32> -> vector<8x64xf32>
    %112 = arith.addf %78, %111 : vector<8x64xf32>
    %113 = vector.extract_strided_slice %31 {offsets = [0, 80], sizes = [8, 16], strides = [1, 1]} : vector<8x128xf32> to vector<8x16xf32>
    %114 = vector.extract_strided_slice %31 {offsets = [0, 112], sizes = [8, 16], strides = [1, 1]} : vector<8x128xf32> to vector<8x16xf32>
    %115 = vector.extract_strided_slice %113 {offsets = [0, 0], sizes = [8, 8], strides = [1, 1]} : vector<8x16xf32> to vector<8x8xf32>
    %116 = vector.extract_strided_slice %113 {offsets = [0, 8], sizes = [8, 8], strides = [1, 1]} : vector<8x16xf32> to vector<8x8xf32>
    %117 = arith.mulf %115, %3 : vector<8x8xf32>
    %118 = arith.mulf %116, %5 : vector<8x8xf32>
    %119 = arith.subf %117, %118 : vector<8x8xf32>
    %120 = arith.mulf %116, %3 : vector<8x8xf32>
    %121 = arith.mulf %115, %5 : vector<8x8xf32>
    %122 = arith.addf %120, %121 : vector<8x8xf32>
    %123 = vector.extract_strided_slice %31 {offsets = [0, 32], sizes = [8, 16], strides = [1, 1]} : vector<8x128xf32> to vector<8x16xf32>
    %124 = vector.extract_strided_slice %123 {offsets = [0, 0], sizes = [8, 8], strides = [1, 1]} : vector<8x16xf32> to vector<8x8xf32>
    %125 = vector.extract_strided_slice %123 {offsets = [0, 8], sizes = [8, 8], strides = [1, 1]} : vector<8x16xf32> to vector<8x8xf32>
    %126 = arith.mulf %124, %3 : vector<8x8xf32>
    %127 = arith.mulf %125, %5 : vector<8x8xf32>
    %128 = arith.subf %126, %127 : vector<8x8xf32>
    %cst_43 = arith.constant 2.500000e-01 : f32
    %129 = vector.broadcast %cst_43 : f32 to vector<8x8xf32>
    %130 = arith.mulf %128, %129 : vector<8x8xf32>
    %131 = arith.mulf %125, %3 : vector<8x8xf32>
    %132 = arith.mulf %124, %5 : vector<8x8xf32>
    %133 = arith.addf %131, %132 : vector<8x8xf32>
    %cst_44 = arith.constant 2.500000e-01 : f32
    %134 = vector.broadcast %cst_44 : f32 to vector<8x8xf32>
    %135 = arith.mulf %133, %134 : vector<8x8xf32>
    %136 = tpu.transpose %119, [1, 0] : vector<8x8xf32> -> vector<8x8xf32>
    %cst_45 = arith.constant dense<0.000000e+00> : vector<8x8xf32>
    %137 = tpu.matmul %130, %136, %cst_45 {dimension_numbers = #tpu.dot_dimension_numbers<[1], [0], [0], [1], [0, 0, 1, 1], [], []>} : vector<8x8xf32>, vector<8x8xf32>, vector<8x8xf32> -> vector<8x8xf32>
    %138 = tpu.transpose %122, [1, 0] : vector<8x8xf32> -> vector<8x8xf32>
    %cst_46 = arith.constant dense<0.000000e+00> : vector<8x8xf32>
    %139 = tpu.matmul %135, %138, %cst_46 {dimension_numbers = #tpu.dot_dimension_numbers<[1], [0], [0], [1], [0, 0, 1, 1], [], []>} : vector<8x8xf32>, vector<8x8xf32>, vector<8x8xf32> -> vector<8x8xf32>
    %140 = arith.addf %137, %139 : vector<8x8xf32>
    %cst_47 = arith.constant -1.000000e+30 : f32
    %141 = vector.broadcast %cst_47 : f32 to vector<8x8xf32>
    %142 = arith.select %8, %140, %141 : vector<8x8xi1>, vector<8x8xf32>
    %cst_48 = arith.constant dense<0xFF800000> : vector<8xf32>
    %143 = vector.multi_reduction <maximumf>, %142, %cst_48 [1] : vector<8x8xf32> to vector<8xf32>
    %144 = vector.shape_cast %143 : vector<8xf32> to vector<8x1xf32>
    %145 = vector.broadcast %144 : vector<8x1xf32> to vector<8x8xf32>
    %146 = arith.subf %142, %145 : vector<8x8xf32>
    %147 = math.exp %146 : vector<8x8xf32>
    %cst_49 = arith.constant dense<0.000000e+00> : vector<8xf32>
    %148 = vector.multi_reduction <add>, %147, %cst_49 [1] : vector<8x8xf32> to vector<8xf32>
    %149 = vector.shape_cast %148 : vector<8xf32> to vector<8x1xf32>
    %150 = tpu.reciprocal %149 {approx = true} : vector<8x1xf32> -> vector<8x1xf32>
    %151 = vector.broadcast %150 : vector<8x1xf32> to vector<8x8xf32>
    %152 = arith.mulf %147, %151 : vector<8x8xf32>
    %cst_50 = arith.constant dense<0.000000e+00> : vector<8x16xf32>
    %153 = tpu.matmul %152, %114, %cst_50 {dimension_numbers = #tpu.dot_dimension_numbers<[1], [0], [0], [1], [0, 0, 1, 1], [], []>} : vector<8x8xf32>, vector<8x16xf32>, vector<8x16xf32> -> vector<8x16xf32>
    %154 = vector.extract_strided_slice %33 {offsets = [32, 0], sizes = [16, 64], strides = [1, 1]} : vector<64x64xf32> to vector<16x64xf32>
    %cst_51 = arith.constant dense<0.000000e+00> : vector<8x64xf32>
    %155 = tpu.matmul %153, %154, %cst_51 {dimension_numbers = #tpu.dot_dimension_numbers<[1], [0], [0], [1], [0, 0, 1, 1], [], []>} : vector<8x16xf32>, vector<16x64xf32>, vector<8x64xf32> -> vector<8x64xf32>
    %156 = arith.addf %112, %155 : vector<8x64xf32>
    %157 = vector.extract_strided_slice %31 {offsets = [0, 48], sizes = [8, 16], strides = [1, 1]} : vector<8x128xf32> to vector<8x16xf32>
    %158 = vector.extract_strided_slice %157 {offsets = [0, 0], sizes = [8, 8], strides = [1, 1]} : vector<8x16xf32> to vector<8x8xf32>
    %159 = vector.extract_strided_slice %157 {offsets = [0, 8], sizes = [8, 8], strides = [1, 1]} : vector<8x16xf32> to vector<8x8xf32>
    %160 = arith.mulf %158, %3 : vector<8x8xf32>
    %161 = arith.mulf %159, %5 : vector<8x8xf32>
    %162 = arith.subf %160, %161 : vector<8x8xf32>
    %cst_52 = arith.constant 2.500000e-01 : f32
    %163 = vector.broadcast %cst_52 : f32 to vector<8x8xf32>
    %164 = arith.mulf %162, %163 : vector<8x8xf32>
    %165 = arith.mulf %159, %3 : vector<8x8xf32>
    %166 = arith.mulf %158, %5 : vector<8x8xf32>
    %167 = arith.addf %165, %166 : vector<8x8xf32>
    %cst_53 = arith.constant 2.500000e-01 : f32
    %168 = vector.broadcast %cst_53 : f32 to vector<8x8xf32>
    %169 = arith.mulf %167, %168 : vector<8x8xf32>
    %170 = tpu.transpose %119, [1, 0] : vector<8x8xf32> -> vector<8x8xf32>
    %cst_54 = arith.constant dense<0.000000e+00> : vector<8x8xf32>
    %171 = tpu.matmul %164, %170, %cst_54 {dimension_numbers = #tpu.dot_dimension_numbers<[1], [0], [0], [1], [0, 0, 1, 1], [], []>} : vector<8x8xf32>, vector<8x8xf32>, vector<8x8xf32> -> vector<8x8xf32>
    %172 = tpu.transpose %122, [1, 0] : vector<8x8xf32> -> vector<8x8xf32>
    %cst_55 = arith.constant dense<0.000000e+00> : vector<8x8xf32>
    %173 = tpu.matmul %169, %172, %cst_55 {dimension_numbers = #tpu.dot_dimension_numbers<[1], [0], [0], [1], [0, 0, 1, 1], [], []>} : vector<8x8xf32>, vector<8x8xf32>, vector<8x8xf32> -> vector<8x8xf32>
    %174 = arith.addf %171, %173 : vector<8x8xf32>
    %cst_56 = arith.constant -1.000000e+30 : f32
    %175 = vector.broadcast %cst_56 : f32 to vector<8x8xf32>
    %176 = arith.select %8, %174, %175 : vector<8x8xi1>, vector<8x8xf32>
    %cst_57 = arith.constant dense<0xFF800000> : vector<8xf32>
    %177 = vector.multi_reduction <maximumf>, %176, %cst_57 [1] : vector<8x8xf32> to vector<8xf32>
    %178 = vector.shape_cast %177 : vector<8xf32> to vector<8x1xf32>
    %179 = vector.broadcast %178 : vector<8x1xf32> to vector<8x8xf32>
    %180 = arith.subf %176, %179 : vector<8x8xf32>
    %181 = math.exp %180 : vector<8x8xf32>
    %cst_58 = arith.constant dense<0.000000e+00> : vector<8xf32>
    %182 = vector.multi_reduction <add>, %181, %cst_58 [1] : vector<8x8xf32> to vector<8xf32>
    %183 = vector.shape_cast %182 : vector<8xf32> to vector<8x1xf32>
    %184 = tpu.reciprocal %183 {approx = true} : vector<8x1xf32> -> vector<8x1xf32>
    %185 = vector.broadcast %184 : vector<8x1xf32> to vector<8x8xf32>
    %186 = arith.mulf %181, %185 : vector<8x8xf32>
    %cst_59 = arith.constant dense<0.000000e+00> : vector<8x16xf32>
    %187 = tpu.matmul %186, %114, %cst_59 {dimension_numbers = #tpu.dot_dimension_numbers<[1], [0], [0], [1], [0, 0, 1, 1], [], []>} : vector<8x8xf32>, vector<8x16xf32>, vector<8x16xf32> -> vector<8x16xf32>
    %188 = vector.extract_strided_slice %33 {offsets = [48, 0], sizes = [16, 64], strides = [1, 1]} : vector<64x64xf32> to vector<16x64xf32>
    %cst_60 = arith.constant dense<0.000000e+00> : vector<8x64xf32>
    %189 = tpu.matmul %187, %188, %cst_60 {dimension_numbers = #tpu.dot_dimension_numbers<[1], [0], [0], [1], [0, 0, 1, 1], [], []>} : vector<8x16xf32>, vector<16x64xf32>, vector<8x64xf32> -> vector<8x64xf32>
    %190 = arith.addf %156, %189 : vector<8x64xf32>
    %191 = arith.addf %190, %10 : vector<8x64xf32>
    %c0_61 = arith.constant 0 : index
    %c0_62 = arith.constant 0 : index
    %c0_63 = arith.constant 0 : index
    %192 = vector.load %arg8[%c0_61, %c0_62, %c0_63] : memref<2x1x64xf32, #tpu.memory_space<vmem>>, vector<1x1x64xf32>
    %193 = vector.shape_cast %192 : vector<1x1x64xf32> to vector<1x64xf32>
    %194 = arith.mulf %191, %191 : vector<8x64xf32>
    %cst_64 = arith.constant dense<0.000000e+00> : vector<8xf32>
    %195 = vector.multi_reduction <add>, %194, %cst_64 [1] : vector<8x64xf32> to vector<8xf32>
    %196 = vector.shape_cast %195 : vector<8xf32> to vector<8x1xf32>
    %cst_65 = arith.constant 6.400000e+01 : f32
    %197 = vector.broadcast %cst_65 : f32 to vector<8x1xf32>
    %198 = arith.divf %196, %197 : vector<8x1xf32>
    %cst_66 = arith.constant 9.99999997E-7 : f32
    %199 = vector.broadcast %cst_66 : f32 to vector<8x1xf32>
    %200 = arith.addf %198, %199 : vector<8x1xf32>
    %201 = math.rsqrt %200 : vector<8x1xf32>
    %202 = vector.broadcast %201 : vector<8x1xf32> to vector<8x64xf32>
    %203 = arith.mulf %191, %202 : vector<8x64xf32>
    %204 = vector.broadcast %193 : vector<1x64xf32> to vector<8x64xf32>
    %205 = arith.mulf %203, %204 : vector<8x64xf32>
    %c0_67 = arith.constant 0 : index
    %c0_68 = arith.constant 0 : index
    %c0_69 = arith.constant 0 : index
    %206 = vector.load %arg9[%c0_67, %c0_68, %c0_69] : memref<2x64x256xf32, #tpu.memory_space<vmem>>, vector<1x64x256xf32>
    %207 = vector.shape_cast %206 : vector<1x64x256xf32> to vector<64x256xf32>
    %cst_70 = arith.constant dense<0.000000e+00> : vector<8x256xf32>
    %208 = tpu.matmul %205, %207, %cst_70 {dimension_numbers = #tpu.dot_dimension_numbers<[1], [0], [0], [1], [0, 0, 1, 1], [], []>} : vector<8x64xf32>, vector<64x256xf32>, vector<8x256xf32> -> vector<8x256xf32>
    %209 = vector.extract_strided_slice %208 {offsets = [0, 0], sizes = [8, 128], strides = [1, 1]} : vector<8x256xf32> to vector<8x128xf32>
    %210 = vector.extract_strided_slice %208 {offsets = [0, 128], sizes = [8, 128], strides = [1, 1]} : vector<8x256xf32> to vector<8x128xf32>
    %211 = arith.negf %209 : vector<8x128xf32>
    %212 = math.exp %211 : vector<8x128xf32>
    %cst_71 = arith.constant 1.000000e+00 : f32
    %213 = vector.broadcast %cst_71 : f32 to vector<8x128xf32>
    %214 = arith.addf %213, %212 : vector<8x128xf32>
    %215 = arith.divf %213, %214 : vector<8x128xf32>
    %216 = arith.mulf %209, %215 : vector<8x128xf32>
    %217 = arith.mulf %216, %210 : vector<8x128xf32>
    %c0_72 = arith.constant 0 : index
    %c0_73 = arith.constant 0 : index
    %c0_74 = arith.constant 0 : index
    %218 = vector.load %arg10[%c0_72, %c0_73, %c0_74] : memref<2x128x64xf32, #tpu.memory_space<vmem>>, vector<1x128x64xf32>
    %219 = vector.shape_cast %218 : vector<1x128x64xf32> to vector<128x64xf32>
    %cst_75 = arith.constant dense<0.000000e+00> : vector<8x64xf32>
    %220 = tpu.matmul %217, %219, %cst_75 {dimension_numbers = #tpu.dot_dimension_numbers<[1], [0], [0], [1], [0, 0, 1, 1], [], []>} : vector<8x128xf32>, vector<128x64xf32>, vector<8x64xf32> -> vector<8x64xf32>
    %221 = arith.addf %220, %191 : vector<8x64xf32>
    %c1 = arith.constant 1 : index
    %c0_76 = arith.constant 0 : index
    %c0_77 = arith.constant 0 : index
    %222 = vector.load %arg4[%c1, %c0_76, %c0_77] : memref<2x1x64xf32, #tpu.memory_space<vmem>>, vector<1x1x64xf32>
    %223 = vector.shape_cast %222 : vector<1x1x64xf32> to vector<1x64xf32>
    %224 = arith.mulf %221, %221 : vector<8x64xf32>
    %cst_78 = arith.constant dense<0.000000e+00> : vector<8xf32>
    %225 = vector.multi_reduction <add>, %224, %cst_78 [1] : vector<8x64xf32> to vector<8xf32>
    %226 = vector.shape_cast %225 : vector<8xf32> to vector<8x1xf32>
    %cst_79 = arith.constant 6.400000e+01 : f32
    %227 = vector.broadcast %cst_79 : f32 to vector<8x1xf32>
    %228 = arith.divf %226, %227 : vector<8x1xf32>
    %cst_80 = arith.constant 9.99999997E-7 : f32
    %229 = vector.broadcast %cst_80 : f32 to vector<8x1xf32>
    %230 = arith.addf %228, %229 : vector<8x1xf32>
    %231 = math.rsqrt %230 : vector<8x1xf32>
    %232 = vector.broadcast %231 : vector<8x1xf32> to vector<8x64xf32>
    %233 = arith.mulf %221, %232 : vector<8x64xf32>
    %234 = vector.broadcast %223 : vector<1x64xf32> to vector<8x64xf32>
    %235 = arith.mulf %233, %234 : vector<8x64xf32>
    %c1_81 = arith.constant 1 : index
    %c0_82 = arith.constant 0 : index
    %c0_83 = arith.constant 0 : index
    %236 = vector.load %arg5[%c1_81, %c0_82, %c0_83] : memref<2x64x128xf32, #tpu.memory_space<vmem>>, vector<1x64x128xf32>
    %237 = vector.shape_cast %236 : vector<1x64x128xf32> to vector<64x128xf32>
    %cst_84 = arith.constant dense<0.000000e+00> : vector<8x128xf32>
    %238 = tpu.matmul %235, %237, %cst_84 {dimension_numbers = #tpu.dot_dimension_numbers<[1], [0], [0], [1], [0, 0, 1, 1], [], []>} : vector<8x64xf32>, vector<64x128xf32>, vector<8x128xf32> -> vector<8x128xf32>
    %c1_85 = arith.constant 1 : index
    %c0_86 = arith.constant 0 : index
    %c0_87 = arith.constant 0 : index
    %239 = vector.load %arg6[%c1_85, %c0_86, %c0_87] : memref<2x1x128xf32, #tpu.memory_space<vmem>>, vector<1x1x128xf32>
    %240 = vector.shape_cast %239 : vector<1x1x128xf32> to vector<1x128xf32>
    %241 = vector.broadcast %240 : vector<1x128xf32> to vector<8x128xf32>
    %242 = arith.addf %238, %241 : vector<8x128xf32>
    %c1_88 = arith.constant 1 : index
    %c0_89 = arith.constant 0 : index
    %c0_90 = arith.constant 0 : index
    %243 = vector.load %arg7[%c1_88, %c0_89, %c0_90] : memref<2x64x64xf32, #tpu.memory_space<vmem>>, vector<1x64x64xf32>
    %244 = vector.shape_cast %243 : vector<1x64x64xf32> to vector<64x64xf32>
    %cst_91 = arith.constant 0.000000e+00 : f32
    %245 = vector.broadcast %cst_91 : f32 to vector<8x64xf32>
    %246 = vector.extract_strided_slice %242 {offsets = [0, 64], sizes = [8, 16], strides = [1, 1]} : vector<8x128xf32> to vector<8x16xf32>
    %247 = vector.extract_strided_slice %242 {offsets = [0, 96], sizes = [8, 16], strides = [1, 1]} : vector<8x128xf32> to vector<8x16xf32>
    %248 = vector.extract_strided_slice %246 {offsets = [0, 0], sizes = [8, 8], strides = [1, 1]} : vector<8x16xf32> to vector<8x8xf32>
    %249 = vector.extract_strided_slice %246 {offsets = [0, 8], sizes = [8, 8], strides = [1, 1]} : vector<8x16xf32> to vector<8x8xf32>
    %250 = arith.mulf %248, %3 : vector<8x8xf32>
    %251 = arith.mulf %249, %5 : vector<8x8xf32>
    %252 = arith.subf %250, %251 : vector<8x8xf32>
    %253 = arith.mulf %249, %3 : vector<8x8xf32>
    %254 = arith.mulf %248, %5 : vector<8x8xf32>
    %255 = arith.addf %253, %254 : vector<8x8xf32>
    %256 = vector.extract_strided_slice %242 {offsets = [0, 0], sizes = [8, 16], strides = [1, 1]} : vector<8x128xf32> to vector<8x16xf32>
    %257 = vector.extract_strided_slice %256 {offsets = [0, 0], sizes = [8, 8], strides = [1, 1]} : vector<8x16xf32> to vector<8x8xf32>
    %258 = vector.extract_strided_slice %256 {offsets = [0, 8], sizes = [8, 8], strides = [1, 1]} : vector<8x16xf32> to vector<8x8xf32>
    %259 = arith.mulf %257, %3 : vector<8x8xf32>
    %260 = arith.mulf %258, %5 : vector<8x8xf32>
    %261 = arith.subf %259, %260 : vector<8x8xf32>
    %cst_92 = arith.constant 2.500000e-01 : f32
    %262 = vector.broadcast %cst_92 : f32 to vector<8x8xf32>
    %263 = arith.mulf %261, %262 : vector<8x8xf32>
    %264 = arith.mulf %258, %3 : vector<8x8xf32>
    %265 = arith.mulf %257, %5 : vector<8x8xf32>
    %266 = arith.addf %264, %265 : vector<8x8xf32>
    %cst_93 = arith.constant 2.500000e-01 : f32
    %267 = vector.broadcast %cst_93 : f32 to vector<8x8xf32>
    %268 = arith.mulf %266, %267 : vector<8x8xf32>
    %269 = tpu.transpose %252, [1, 0] : vector<8x8xf32> -> vector<8x8xf32>
    %cst_94 = arith.constant dense<0.000000e+00> : vector<8x8xf32>
    %270 = tpu.matmul %263, %269, %cst_94 {dimension_numbers = #tpu.dot_dimension_numbers<[1], [0], [0], [1], [0, 0, 1, 1], [], []>} : vector<8x8xf32>, vector<8x8xf32>, vector<8x8xf32> -> vector<8x8xf32>
    %271 = tpu.transpose %255, [1, 0] : vector<8x8xf32> -> vector<8x8xf32>
    %cst_95 = arith.constant dense<0.000000e+00> : vector<8x8xf32>
    %272 = tpu.matmul %268, %271, %cst_95 {dimension_numbers = #tpu.dot_dimension_numbers<[1], [0], [0], [1], [0, 0, 1, 1], [], []>} : vector<8x8xf32>, vector<8x8xf32>, vector<8x8xf32> -> vector<8x8xf32>
    %273 = arith.addf %270, %272 : vector<8x8xf32>
    %cst_96 = arith.constant -1.000000e+30 : f32
    %274 = vector.broadcast %cst_96 : f32 to vector<8x8xf32>
    %275 = arith.select %8, %273, %274 : vector<8x8xi1>, vector<8x8xf32>
    %cst_97 = arith.constant dense<0xFF800000> : vector<8xf32>
    %276 = vector.multi_reduction <maximumf>, %275, %cst_97 [1] : vector<8x8xf32> to vector<8xf32>
    %277 = vector.shape_cast %276 : vector<8xf32> to vector<8x1xf32>
    %278 = vector.broadcast %277 : vector<8x1xf32> to vector<8x8xf32>
    %279 = arith.subf %275, %278 : vector<8x8xf32>
    %280 = math.exp %279 : vector<8x8xf32>
    %cst_98 = arith.constant dense<0.000000e+00> : vector<8xf32>
    %281 = vector.multi_reduction <add>, %280, %cst_98 [1] : vector<8x8xf32> to vector<8xf32>
    %282 = vector.shape_cast %281 : vector<8xf32> to vector<8x1xf32>
    %283 = tpu.reciprocal %282 {approx = true} : vector<8x1xf32> -> vector<8x1xf32>
    %284 = vector.broadcast %283 : vector<8x1xf32> to vector<8x8xf32>
    %285 = arith.mulf %280, %284 : vector<8x8xf32>
    %cst_99 = arith.constant dense<0.000000e+00> : vector<8x16xf32>
    %286 = tpu.matmul %285, %247, %cst_99 {dimension_numbers = #tpu.dot_dimension_numbers<[1], [0], [0], [1], [0, 0, 1, 1], [], []>} : vector<8x8xf32>, vector<8x16xf32>, vector<8x16xf32> -> vector<8x16xf32>
    %287 = vector.extract_strided_slice %244 {offsets = [0, 0], sizes = [16, 64], strides = [1, 1]} : vector<64x64xf32> to vector<16x64xf32>
    %cst_100 = arith.constant dense<0.000000e+00> : vector<8x64xf32>
    %288 = tpu.matmul %286, %287, %cst_100 {dimension_numbers = #tpu.dot_dimension_numbers<[1], [0], [0], [1], [0, 0, 1, 1], [], []>} : vector<8x16xf32>, vector<16x64xf32>, vector<8x64xf32> -> vector<8x64xf32>
    %289 = arith.addf %245, %288 : vector<8x64xf32>
    %290 = vector.extract_strided_slice %242 {offsets = [0, 16], sizes = [8, 16], strides = [1, 1]} : vector<8x128xf32> to vector<8x16xf32>
    %291 = vector.extract_strided_slice %290 {offsets = [0, 0], sizes = [8, 8], strides = [1, 1]} : vector<8x16xf32> to vector<8x8xf32>
    %292 = vector.extract_strided_slice %290 {offsets = [0, 8], sizes = [8, 8], strides = [1, 1]} : vector<8x16xf32> to vector<8x8xf32>
    %293 = arith.mulf %291, %3 : vector<8x8xf32>
    %294 = arith.mulf %292, %5 : vector<8x8xf32>
    %295 = arith.subf %293, %294 : vector<8x8xf32>
    %cst_101 = arith.constant 2.500000e-01 : f32
    %296 = vector.broadcast %cst_101 : f32 to vector<8x8xf32>
    %297 = arith.mulf %295, %296 : vector<8x8xf32>
    %298 = arith.mulf %292, %3 : vector<8x8xf32>
    %299 = arith.mulf %291, %5 : vector<8x8xf32>
    %300 = arith.addf %298, %299 : vector<8x8xf32>
    %cst_102 = arith.constant 2.500000e-01 : f32
    %301 = vector.broadcast %cst_102 : f32 to vector<8x8xf32>
    %302 = arith.mulf %300, %301 : vector<8x8xf32>
    %303 = tpu.transpose %252, [1, 0] : vector<8x8xf32> -> vector<8x8xf32>
    %cst_103 = arith.constant dense<0.000000e+00> : vector<8x8xf32>
    %304 = tpu.matmul %297, %303, %cst_103 {dimension_numbers = #tpu.dot_dimension_numbers<[1], [0], [0], [1], [0, 0, 1, 1], [], []>} : vector<8x8xf32>, vector<8x8xf32>, vector<8x8xf32> -> vector<8x8xf32>
    %305 = tpu.transpose %255, [1, 0] : vector<8x8xf32> -> vector<8x8xf32>
    %cst_104 = arith.constant dense<0.000000e+00> : vector<8x8xf32>
    %306 = tpu.matmul %302, %305, %cst_104 {dimension_numbers = #tpu.dot_dimension_numbers<[1], [0], [0], [1], [0, 0, 1, 1], [], []>} : vector<8x8xf32>, vector<8x8xf32>, vector<8x8xf32> -> vector<8x8xf32>
    %307 = arith.addf %304, %306 : vector<8x8xf32>
    %cst_105 = arith.constant -1.000000e+30 : f32
    %308 = vector.broadcast %cst_105 : f32 to vector<8x8xf32>
    %309 = arith.select %8, %307, %308 : vector<8x8xi1>, vector<8x8xf32>
    %cst_106 = arith.constant dense<0xFF800000> : vector<8xf32>
    %310 = vector.multi_reduction <maximumf>, %309, %cst_106 [1] : vector<8x8xf32> to vector<8xf32>
    %311 = vector.shape_cast %310 : vector<8xf32> to vector<8x1xf32>
    %312 = vector.broadcast %311 : vector<8x1xf32> to vector<8x8xf32>
    %313 = arith.subf %309, %312 : vector<8x8xf32>
    %314 = math.exp %313 : vector<8x8xf32>
    %cst_107 = arith.constant dense<0.000000e+00> : vector<8xf32>
    %315 = vector.multi_reduction <add>, %314, %cst_107 [1] : vector<8x8xf32> to vector<8xf32>
    %316 = vector.shape_cast %315 : vector<8xf32> to vector<8x1xf32>
    %317 = tpu.reciprocal %316 {approx = true} : vector<8x1xf32> -> vector<8x1xf32>
    %318 = vector.broadcast %317 : vector<8x1xf32> to vector<8x8xf32>
    %319 = arith.mulf %314, %318 : vector<8x8xf32>
    %cst_108 = arith.constant dense<0.000000e+00> : vector<8x16xf32>
    %320 = tpu.matmul %319, %247, %cst_108 {dimension_numbers = #tpu.dot_dimension_numbers<[1], [0], [0], [1], [0, 0, 1, 1], [], []>} : vector<8x8xf32>, vector<8x16xf32>, vector<8x16xf32> -> vector<8x16xf32>
    %321 = vector.extract_strided_slice %244 {offsets = [16, 0], sizes = [16, 64], strides = [1, 1]} : vector<64x64xf32> to vector<16x64xf32>
    %cst_109 = arith.constant dense<0.000000e+00> : vector<8x64xf32>
    %322 = tpu.matmul %320, %321, %cst_109 {dimension_numbers = #tpu.dot_dimension_numbers<[1], [0], [0], [1], [0, 0, 1, 1], [], []>} : vector<8x16xf32>, vector<16x64xf32>, vector<8x64xf32> -> vector<8x64xf32>
    %323 = arith.addf %289, %322 : vector<8x64xf32>
    %324 = vector.extract_strided_slice %242 {offsets = [0, 80], sizes = [8, 16], strides = [1, 1]} : vector<8x128xf32> to vector<8x16xf32>
    %325 = vector.extract_strided_slice %242 {offsets = [0, 112], sizes = [8, 16], strides = [1, 1]} : vector<8x128xf32> to vector<8x16xf32>
    %326 = vector.extract_strided_slice %324 {offsets = [0, 0], sizes = [8, 8], strides = [1, 1]} : vector<8x16xf32> to vector<8x8xf32>
    %327 = vector.extract_strided_slice %324 {offsets = [0, 8], sizes = [8, 8], strides = [1, 1]} : vector<8x16xf32> to vector<8x8xf32>
    %328 = arith.mulf %326, %3 : vector<8x8xf32>
    %329 = arith.mulf %327, %5 : vector<8x8xf32>
    %330 = arith.subf %328, %329 : vector<8x8xf32>
    %331 = arith.mulf %327, %3 : vector<8x8xf32>
    %332 = arith.mulf %326, %5 : vector<8x8xf32>
    %333 = arith.addf %331, %332 : vector<8x8xf32>
    %334 = vector.extract_strided_slice %242 {offsets = [0, 32], sizes = [8, 16], strides = [1, 1]} : vector<8x128xf32> to vector<8x16xf32>
    %335 = vector.extract_strided_slice %334 {offsets = [0, 0], sizes = [8, 8], strides = [1, 1]} : vector<8x16xf32> to vector<8x8xf32>
    %336 = vector.extract_strided_slice %334 {offsets = [0, 8], sizes = [8, 8], strides = [1, 1]} : vector<8x16xf32> to vector<8x8xf32>
    %337 = arith.mulf %335, %3 : vector<8x8xf32>
    %338 = arith.mulf %336, %5 : vector<8x8xf32>
    %339 = arith.subf %337, %338 : vector<8x8xf32>
    %cst_110 = arith.constant 2.500000e-01 : f32
    %340 = vector.broadcast %cst_110 : f32 to vector<8x8xf32>
    %341 = arith.mulf %339, %340 : vector<8x8xf32>
    %342 = arith.mulf %336, %3 : vector<8x8xf32>
    %343 = arith.mulf %335, %5 : vector<8x8xf32>
    %344 = arith.addf %342, %343 : vector<8x8xf32>
    %cst_111 = arith.constant 2.500000e-01 : f32
    %345 = vector.broadcast %cst_111 : f32 to vector<8x8xf32>
    %346 = arith.mulf %344, %345 : vector<8x8xf32>
    %347 = tpu.transpose %330, [1, 0] : vector<8x8xf32> -> vector<8x8xf32>
    %cst_112 = arith.constant dense<0.000000e+00> : vector<8x8xf32>
    %348 = tpu.matmul %341, %347, %cst_112 {dimension_numbers = #tpu.dot_dimension_numbers<[1], [0], [0], [1], [0, 0, 1, 1], [], []>} : vector<8x8xf32>, vector<8x8xf32>, vector<8x8xf32> -> vector<8x8xf32>
    %349 = tpu.transpose %333, [1, 0] : vector<8x8xf32> -> vector<8x8xf32>
    %cst_113 = arith.constant dense<0.000000e+00> : vector<8x8xf32>
    %350 = tpu.matmul %346, %349, %cst_113 {dimension_numbers = #tpu.dot_dimension_numbers<[1], [0], [0], [1], [0, 0, 1, 1], [], []>} : vector<8x8xf32>, vector<8x8xf32>, vector<8x8xf32> -> vector<8x8xf32>
    %351 = arith.addf %348, %350 : vector<8x8xf32>
    %cst_114 = arith.constant -1.000000e+30 : f32
    %352 = vector.broadcast %cst_114 : f32 to vector<8x8xf32>
    %353 = arith.select %8, %351, %352 : vector<8x8xi1>, vector<8x8xf32>
    %cst_115 = arith.constant dense<0xFF800000> : vector<8xf32>
    %354 = vector.multi_reduction <maximumf>, %353, %cst_115 [1] : vector<8x8xf32> to vector<8xf32>
    %355 = vector.shape_cast %354 : vector<8xf32> to vector<8x1xf32>
    %356 = vector.broadcast %355 : vector<8x1xf32> to vector<8x8xf32>
    %357 = arith.subf %353, %356 : vector<8x8xf32>
    %358 = math.exp %357 : vector<8x8xf32>
    %cst_116 = arith.constant dense<0.000000e+00> : vector<8xf32>
    %359 = vector.multi_reduction <add>, %358, %cst_116 [1] : vector<8x8xf32> to vector<8xf32>
    %360 = vector.shape_cast %359 : vector<8xf32> to vector<8x1xf32>
    %361 = tpu.reciprocal %360 {approx = true} : vector<8x1xf32> -> vector<8x1xf32>
    %362 = vector.broadcast %361 : vector<8x1xf32> to vector<8x8xf32>
    %363 = arith.mulf %358, %362 : vector<8x8xf32>
    %cst_117 = arith.constant dense<0.000000e+00> : vector<8x16xf32>
    %364 = tpu.matmul %363, %325, %cst_117 {dimension_numbers = #tpu.dot_dimension_numbers<[1], [0], [0], [1], [0, 0, 1, 1], [], []>} : vector<8x8xf32>, vector<8x16xf32>, vector<8x16xf32> -> vector<8x16xf32>
    %365 = vector.extract_strided_slice %244 {offsets = [32, 0], sizes = [16, 64], strides = [1, 1]} : vector<64x64xf32> to vector<16x64xf32>
    %cst_118 = arith.constant dense<0.000000e+00> : vector<8x64xf32>
    %366 = tpu.matmul %364, %365, %cst_118 {dimension_numbers = #tpu.dot_dimension_numbers<[1], [0], [0], [1], [0, 0, 1, 1], [], []>} : vector<8x16xf32>, vector<16x64xf32>, vector<8x64xf32> -> vector<8x64xf32>
    %367 = arith.addf %323, %366 : vector<8x64xf32>
    %368 = vector.extract_strided_slice %242 {offsets = [0, 48], sizes = [8, 16], strides = [1, 1]} : vector<8x128xf32> to vector<8x16xf32>
    %369 = vector.extract_strided_slice %368 {offsets = [0, 0], sizes = [8, 8], strides = [1, 1]} : vector<8x16xf32> to vector<8x8xf32>
    %370 = vector.extract_strided_slice %368 {offsets = [0, 8], sizes = [8, 8], strides = [1, 1]} : vector<8x16xf32> to vector<8x8xf32>
    %371 = arith.mulf %369, %3 : vector<8x8xf32>
    %372 = arith.mulf %370, %5 : vector<8x8xf32>
    %373 = arith.subf %371, %372 : vector<8x8xf32>
    %cst_119 = arith.constant 2.500000e-01 : f32
    %374 = vector.broadcast %cst_119 : f32 to vector<8x8xf32>
    %375 = arith.mulf %373, %374 : vector<8x8xf32>
    %376 = arith.mulf %370, %3 : vector<8x8xf32>
    %377 = arith.mulf %369, %5 : vector<8x8xf32>
    %378 = arith.addf %376, %377 : vector<8x8xf32>
    %cst_120 = arith.constant 2.500000e-01 : f32
    %379 = vector.broadcast %cst_120 : f32 to vector<8x8xf32>
    %380 = arith.mulf %378, %379 : vector<8x8xf32>
    %381 = tpu.transpose %330, [1, 0] : vector<8x8xf32> -> vector<8x8xf32>
    %cst_121 = arith.constant dense<0.000000e+00> : vector<8x8xf32>
    %382 = tpu.matmul %375, %381, %cst_121 {dimension_numbers = #tpu.dot_dimension_numbers<[1], [0], [0], [1], [0, 0, 1, 1], [], []>} : vector<8x8xf32>, vector<8x8xf32>, vector<8x8xf32> -> vector<8x8xf32>
    %383 = tpu.transpose %333, [1, 0] : vector<8x8xf32> -> vector<8x8xf32>
    %cst_122 = arith.constant dense<0.000000e+00> : vector<8x8xf32>
    %384 = tpu.matmul %380, %383, %cst_122 {dimension_numbers = #tpu.dot_dimension_numbers<[1], [0], [0], [1], [0, 0, 1, 1], [], []>} : vector<8x8xf32>, vector<8x8xf32>, vector<8x8xf32> -> vector<8x8xf32>
    %385 = arith.addf %382, %384 : vector<8x8xf32>
    %cst_123 = arith.constant -1.000000e+30 : f32
    %386 = vector.broadcast %cst_123 : f32 to vector<8x8xf32>
    %387 = arith.select %8, %385, %386 : vector<8x8xi1>, vector<8x8xf32>
    %cst_124 = arith.constant dense<0xFF800000> : vector<8xf32>
    %388 = vector.multi_reduction <maximumf>, %387, %cst_124 [1] : vector<8x8xf32> to vector<8xf32>
    %389 = vector.shape_cast %388 : vector<8xf32> to vector<8x1xf32>
    %390 = vector.broadcast %389 : vector<8x1xf32> to vector<8x8xf32>
    %391 = arith.subf %387, %390 : vector<8x8xf32>
    %392 = math.exp %391 : vector<8x8xf32>
    %cst_125 = arith.constant dense<0.000000e+00> : vector<8xf32>
    %393 = vector.multi_reduction <add>, %392, %cst_125 [1] : vector<8x8xf32> to vector<8xf32>
    %394 = vector.shape_cast %393 : vector<8xf32> to vector<8x1xf32>
    %395 = tpu.reciprocal %394 {approx = true} : vector<8x1xf32> -> vector<8x1xf32>
    %396 = vector.broadcast %395 : vector<8x1xf32> to vector<8x8xf32>
    %397 = arith.mulf %392, %396 : vector<8x8xf32>
    %cst_126 = arith.constant dense<0.000000e+00> : vector<8x16xf32>
    %398 = tpu.matmul %397, %325, %cst_126 {dimension_numbers = #tpu.dot_dimension_numbers<[1], [0], [0], [1], [0, 0, 1, 1], [], []>} : vector<8x8xf32>, vector<8x16xf32>, vector<8x16xf32> -> vector<8x16xf32>
    %399 = vector.extract_strided_slice %244 {offsets = [48, 0], sizes = [16, 64], strides = [1, 1]} : vector<64x64xf32> to vector<16x64xf32>
    %cst_127 = arith.constant dense<0.000000e+00> : vector<8x64xf32>
    %400 = tpu.matmul %398, %399, %cst_127 {dimension_numbers = #tpu.dot_dimension_numbers<[1], [0], [0], [1], [0, 0, 1, 1], [], []>} : vector<8x16xf32>, vector<16x64xf32>, vector<8x64xf32> -> vector<8x64xf32>
    %401 = arith.addf %367, %400 : vector<8x64xf32>
    %402 = arith.addf %401, %221 : vector<8x64xf32>
    %c1_128 = arith.constant 1 : index
    %c0_129 = arith.constant 0 : index
    %c0_130 = arith.constant 0 : index
    %403 = vector.load %arg8[%c1_128, %c0_129, %c0_130] : memref<2x1x64xf32, #tpu.memory_space<vmem>>, vector<1x1x64xf32>
    %404 = vector.shape_cast %403 : vector<1x1x64xf32> to vector<1x64xf32>
    %405 = arith.mulf %402, %402 : vector<8x64xf32>
    %cst_131 = arith.constant dense<0.000000e+00> : vector<8xf32>
    %406 = vector.multi_reduction <add>, %405, %cst_131 [1] : vector<8x64xf32> to vector<8xf32>
    %407 = vector.shape_cast %406 : vector<8xf32> to vector<8x1xf32>
    %cst_132 = arith.constant 6.400000e+01 : f32
    %408 = vector.broadcast %cst_132 : f32 to vector<8x1xf32>
    %409 = arith.divf %407, %408 : vector<8x1xf32>
    %cst_133 = arith.constant 9.99999997E-7 : f32
    %410 = vector.broadcast %cst_133 : f32 to vector<8x1xf32>
    %411 = arith.addf %409, %410 : vector<8x1xf32>
    %412 = math.rsqrt %411 : vector<8x1xf32>
    %413 = vector.broadcast %412 : vector<8x1xf32> to vector<8x64xf32>
    %414 = arith.mulf %402, %413 : vector<8x64xf32>
    %415 = vector.broadcast %404 : vector<1x64xf32> to vector<8x64xf32>
    %416 = arith.mulf %414, %415 : vector<8x64xf32>
    %c1_134 = arith.constant 1 : index
    %c0_135 = arith.constant 0 : index
    %c0_136 = arith.constant 0 : index
    %417 = vector.load %arg9[%c1_134, %c0_135, %c0_136] : memref<2x64x256xf32, #tpu.memory_space<vmem>>, vector<1x64x256xf32>
    %418 = vector.shape_cast %417 : vector<1x64x256xf32> to vector<64x256xf32>
    %cst_137 = arith.constant dense<0.000000e+00> : vector<8x256xf32>
    %419 = tpu.matmul %416, %418, %cst_137 {dimension_numbers = #tpu.dot_dimension_numbers<[1], [0], [0], [1], [0, 0, 1, 1], [], []>} : vector<8x64xf32>, vector<64x256xf32>, vector<8x256xf32> -> vector<8x256xf32>
    %420 = vector.extract_strided_slice %419 {offsets = [0, 0], sizes = [8, 128], strides = [1, 1]} : vector<8x256xf32> to vector<8x128xf32>
    %421 = vector.extract_strided_slice %419 {offsets = [0, 128], sizes = [8, 128], strides = [1, 1]} : vector<8x256xf32> to vector<8x128xf32>
    %422 = arith.negf %420 : vector<8x128xf32>
    %423 = math.exp %422 : vector<8x128xf32>
    %cst_138 = arith.constant 1.000000e+00 : f32
    %424 = vector.broadcast %cst_138 : f32 to vector<8x128xf32>
    %425 = arith.addf %424, %423 : vector<8x128xf32>
    %426 = arith.divf %424, %425 : vector<8x128xf32>
    %427 = arith.mulf %420, %426 : vector<8x128xf32>
    %428 = arith.mulf %427, %421 : vector<8x128xf32>
    %c1_139 = arith.constant 1 : index
    %c0_140 = arith.constant 0 : index
    %c0_141 = arith.constant 0 : index
    %429 = vector.load %arg10[%c1_139, %c0_140, %c0_141] : memref<2x128x64xf32, #tpu.memory_space<vmem>>, vector<1x128x64xf32>
    %430 = vector.shape_cast %429 : vector<1x128x64xf32> to vector<128x64xf32>
    %cst_142 = arith.constant dense<0.000000e+00> : vector<8x64xf32>
    %431 = tpu.matmul %428, %430, %cst_142 {dimension_numbers = #tpu.dot_dimension_numbers<[1], [0], [0], [1], [0, 0, 1, 1], [], []>} : vector<8x128xf32>, vector<128x64xf32>, vector<8x64xf32> -> vector<8x64xf32>
    %432 = arith.addf %431, %402 : vector<8x64xf32>
    %c0_143 = arith.constant 0 : index
    %c0_144 = arith.constant 0 : index
    %433 = vector.load %arg11[%c0_143, %c0_144] : memref<1x64xf32, #tpu.memory_space<vmem>>, vector<1x64xf32>
    %434 = arith.mulf %432, %432 : vector<8x64xf32>
    %cst_145 = arith.constant dense<0.000000e+00> : vector<8xf32>
    %435 = vector.multi_reduction <add>, %434, %cst_145 [1] : vector<8x64xf32> to vector<8xf32>
    %436 = vector.shape_cast %435 : vector<8xf32> to vector<8x1xf32>
    %cst_146 = arith.constant 6.400000e+01 : f32
    %437 = vector.broadcast %cst_146 : f32 to vector<8x1xf32>
    %438 = arith.divf %436, %437 : vector<8x1xf32>
    %cst_147 = arith.constant 9.99999997E-7 : f32
    %439 = vector.broadcast %cst_147 : f32 to vector<8x1xf32>
    %440 = arith.addf %438, %439 : vector<8x1xf32>
    %441 = math.rsqrt %440 : vector<8x1xf32>
    %442 = vector.broadcast %441 : vector<8x1xf32> to vector<8x64xf32>
    %443 = arith.mulf %432, %442 : vector<8x64xf32>
    %444 = vector.broadcast %433 : vector<1x64xf32> to vector<8x64xf32>
    %445 = arith.mulf %443, %444 : vector<8x64xf32>
    %cst_148 = arith.constant dense<0.000000e+00> : vector<64xf32>
    %446 = vector.multi_reduction <add>, %445, %cst_148 [0] : vector<8x64xf32> to vector<64xf32>
    %447 = vector.shape_cast %446 : vector<64xf32> to vector<1x64xf32>
    %cst_149 = arith.constant 8.000000e+00 : f32
    %448 = vector.broadcast %cst_149 : f32 to vector<1x64xf32>
    %449 = arith.divf %447, %448 : vector<1x64xf32>
    %c0_150 = arith.constant 0 : index
    %c0_151 = arith.constant 0 : index
    %450 = vector.load %arg12[%c0_150, %c0_151] : memref<64x32xf32, #tpu.memory_space<vmem>>, vector<64x32xf32>
    %cst_152 = arith.constant dense<0.000000e+00> : vector<1x32xf32>
    %451 = tpu.matmul %449, %450, %cst_152 {dimension_numbers = #tpu.dot_dimension_numbers<[1], [0], [0], [1], [0, 0, 1, 1], [], []>} : vector<1x64xf32>, vector<64x32xf32>, vector<1x32xf32> -> vector<1x32xf32>
    %c0_153 = arith.constant 0 : index
    %c0_154 = arith.constant 0 : index
    %452 = vector.load %arg13[%c0_153, %c0_154] : memref<1x32xf32, #tpu.memory_space<vmem>>, vector<1x32xf32>
    %453 = arith.addf %451, %452 : vector<1x32xf32>
    %c0_155 = arith.constant 0 : index
    %c0_156 = arith.constant 0 : index
    %c0_157 = arith.constant 0 : index
    %454 = vector.load %arg14[%c0_155, %c0_156, %c0_157] : memref<1x1x32xf32, #tpu.memory_space<vmem>>, vector<1x1x32xf32>
    %455 = vector.shape_cast %454 : vector<1x1x32xf32> to vector<1x32xf32>
    %456 = vector.shape_cast %453 : vector<1x32xf32> to vector<1x1x32xf32>
    tpu.vector_store %arg14[%c0_155, %c0_156, %c0_157], %456 {strides = array<i32>} : memref<1x1x32xf32, #tpu.memory_space<vmem>>, vector<1x1x32xf32>,
    return
  }
  func.func @transform_0(%arg0: i32) -> (i32, i32, i32) {
    %c0_i32 = arith.constant 0 : i32
    %c0_i32_0 = arith.constant 0 : i32
    %c0_i32_1 = arith.constant 0 : i32
    return %arg0, %c0_i32, %c0_i32_0 : i32, i32, i32
  }
  func.func @transform_1(%arg0: i32) -> (i32, i32, i32) {
    %c0_i32 = arith.constant 0 : i32
    %c0_i32_0 = arith.constant 0 : i32
    %c0_i32_1 = arith.constant 0 : i32
    return %arg0, %c0_i32, %c0_i32_0 : i32, i32, i32
  }
  func.func @transform_2(%arg0: i32) -> (i32, i32, i32) {
    %c0_i32 = arith.constant 0 : i32
    %c0_i32_0 = arith.constant 0 : i32
    %c0_i32_1 = arith.constant 0 : i32
    return %arg0, %c0_i32, %c0_i32_0 : i32, i32, i32
  }
  func.func @transform_3(%arg0: i32) -> (i32, i32, i32) {
    %c0_i32 = arith.constant 0 : i32
    %c0_i32_0 = arith.constant 0 : i32
    %c0_i32_1 = arith.constant 0 : i32
    %c0_i32_2 = arith.constant 0 : i32
    return %c0_i32, %c0_i32_0, %c0_i32_1 : i32, i32, i32
  }
  func.func @transform_4(%arg0: i32) -> (i32, i32, i32) {
    %c0_i32 = arith.constant 0 : i32
    %c0_i32_0 = arith.constant 0 : i32
    %c0_i32_1 = arith.constant 0 : i32
    %c0_i32_2 = arith.constant 0 : i32
    return %c0_i32, %c0_i32_0, %c0_i32_1 : i32, i32, i32
  }
  func.func @transform_5(%arg0: i32) -> (i32, i32, i32) {
    %c0_i32 = arith.constant 0 : i32
    %c0_i32_0 = arith.constant 0 : i32
    %c0_i32_1 = arith.constant 0 : i32
    %c0_i32_2 = arith.constant 0 : i32
    return %c0_i32, %c0_i32_0, %c0_i32_1 : i32, i32, i32
  }
  func.func @transform_6(%arg0: i32) -> (i32, i32, i32) {
    %c0_i32 = arith.constant 0 : i32
    %c0_i32_0 = arith.constant 0 : i32
    %c0_i32_1 = arith.constant 0 : i32
    %c0_i32_2 = arith.constant 0 : i32
    return %c0_i32, %c0_i32_0, %c0_i32_1 : i32, i32, i32
  }
  func.func @transform_7(%arg0: i32) -> (i32, i32, i32) {
    %c0_i32 = arith.constant 0 : i32
    %c0_i32_0 = arith.constant 0 : i32
    %c0_i32_1 = arith.constant 0 : i32
    %c0_i32_2 = arith.constant 0 : i32
    return %c0_i32, %c0_i32_0, %c0_i32_1 : i32, i32, i32
  }
  func.func @transform_8(%arg0: i32) -> (i32, i32, i32) {
    %c0_i32 = arith.constant 0 : i32
    %c0_i32_0 = arith.constant 0 : i32
    %c0_i32_1 = arith.constant 0 : i32
    %c0_i32_2 = arith.constant 0 : i32
    return %c0_i32, %c0_i32_0, %c0_i32_1 : i32, i32, i32
  }
  func.func @transform_9(%arg0: i32) -> (i32, i32, i32) {
    %c0_i32 = arith.constant 0 : i32
    %c0_i32_0 = arith.constant 0 : i32
    %c0_i32_1 = arith.constant 0 : i32
    %c0_i32_2 = arith.constant 0 : i32
    return %c0_i32, %c0_i32_0, %c0_i32_1 : i32, i32, i32
  }
  func.func @transform_10(%arg0: i32) -> (i32, i32) {
    %c0_i32 = arith.constant 0 : i32
    %c0_i32_0 = arith.constant 0 : i32
    %c0_i32_1 = arith.constant 0 : i32
    return %c0_i32, %c0_i32_0 : i32, i32
  }
  func.func @transform_11(%arg0: i32) -> (i32, i32) {
    %c0_i32 = arith.constant 0 : i32
    %c0_i32_0 = arith.constant 0 : i32
    %c0_i32_1 = arith.constant 0 : i32
    return %c0_i32, %c0_i32_0 : i32, i32
  }
  func.func @transform_12(%arg0: i32) -> (i32, i32) {
    %c0_i32 = arith.constant 0 : i32
    %c0_i32_0 = arith.constant 0 : i32
    %c0_i32_1 = arith.constant 0 : i32
    return %c0_i32, %c0_i32_0 : i32, i32
  }
  func.func @transform_13(%arg0: i32) -> (i32, i32, i32) {
    %c0_i32 = arith.constant 0 : i32
    %c0_i32_0 = arith.constant 0 : i32
    %c0_i32_1 = arith.constant 0 : i32
    return %arg0, %c0_i32, %c0_i32_0 : i32, i32, i32
  }
}

</mosaic_0001>

<bundles_post_ra>
// kernel: forward.1
= control target key start
LH: loop header
LB: loop body
LE: loop exit
PB: predicated region body
PF: predicated region fallthrough
CT: control target
= control target key end

     0   :  { %s3424_s0 = inlined_call_operand.vmem [shape: f32[2,8,64], index: 0, kind: input, shape index: {}]   ;;  %s3425_s1 = inlined_call_operand.vmem [shape: f32[2,8,8], index: 1, kind: input, shape index: {}]   ;;  %s3426_s2 = inlined_call_operand.vmem [shape: f32[2,8,8], index: 2, kind: input, shape index: {}]   ;;  %s3427_s3 = inlined_call_operand.vmem [shape: f32[2,1,64], index: 3, kind: input, shape index: {}]   ;;  %s3428_s4 = inlined_call_operand.vmem [shape: f32[2,64,128], index: 4, kind: input, shape index: {}]   ;;  %s3429_s5 = inlined_call_operand.vmem [shape: f32[2,1,128], index: 5, kind: input, shape index: {}]   ;;  %s3430_s6 = inlined_call_operand.vmem [shape: f32[2,64,64], index: 6, kind: input, shape index: {}]   ;;  %s3431_s7 = inlined_call_operand.vmem [shape: f32[2,1,64], index: 7, kind: input, shape index: {}]   ;;  %s3432_s8 = inlined_call_operand.vmem [shape: f32[2,64,256], index: 8, kind: input, shape index: {}]   ;;  %s3433_s9 = inlined_call_operand.vmem [shape: f32[2,128,64], index: 9, kind: input, shape index: {}]   ;;  %s3434_s10 = inlined_call_operand.vmem [shape: f32[1,64], index: 10, kind: input, shape index: {}]   ;;  %s3435_s11 = inlined_call_operand.vmem [shape: f32[64,32], index: 11, kind: input, shape index: {}]   ;;  %s3436_s12 = inlined_call_operand.vmem [shape: f32[1,32], index: 12, kind: input, shape index: {}]   ;;  %s3437_s13 = inlined_call_operand.hbm [shape: f32[2,1,32], index: 13, kind: output, shape index: {}]  }
   0x1   :  { %3461 = sst [smem:[#allocation9_spill]] %s3424_s0 }
   0x2   :  { %3462 = sst [smem:[#allocation10_spill]] %s3425_s1 }
   0x3   :  { %3463 = sst [smem:[#allocation11_spill]] %s3426_s2 }
   0x4   :  { %18 = vsyncpa [#allocation3], 0 }
   0x5   :  { %20 = vsyncpa [#allocation3 + $0x1], 0  ;;  %s2622_s25 = smov 0   ;;  %s2624_s26 = smov 0  }
   0x6   :  { %s2626_s27 = smov 0   ;;  %s2628_s28 = smov 0  }
   0x7 LB: > { %3464 = sst [smem:[#allocation5_spill]] %s2529_s27  ;;  %s2643_s29 = sadd.s32 4294967295, %s2533_s28   ;;  %s2533_s28 = sphi %s2628_s28, %s3490_s28   ;;  %s2529_s27 = sphi %s2626_s27, %s3492_s27   ;;  %s2525_s26 = sphi %s2624_s26, %s3494_s26   ;;  %s2521_s25 = sphi %s2622_s25, %s3493_s25  }
   0x8   : > { %s2236_s30 = sadd.s32 4294967294, %s2533_s28   ;;  %s2647_s14 = sadd.s32 1, %s2533_s28  }
   0x9   : > { %3465 = sst [smem:[#allocation6_spill]] %s2647_s14  ;;  %s321_s15 = sadd.s32 1, %s2529_s27 }
   0xa   : > { %s318_s16 = ssub.s32 %s2533_s28, %s2647_s14  ;;  %p331_p0 = scmp.ne.s32.totalorder %s2529_s27, %s2525_s26 }
   0xb   : > { %p319_p1 = scmp.eq.s32.totalorder %s318_s16, 0  ;;  %p332_p2 = scmp.eq.s32.totalorder %s2643_s29, 1 }
   0xc   : > { %p337_p3 = scmp.ne.s32.totalorder %s2525_s26, %s2521_s25  ;;  %p338_p4 = scmp.eq.s32.totalorder %s2236_s30, 1 }
   0xd   : > { %s2658_s17 = scalar_select %p319_p1, %s2529_s27, %s321_s15  }
   0xe   : > { %p2660_p5 = por %p332_p2, %p331_p0  ;;  %p2664_p6 = por %p338_p4, %p337_p3 }
   0xf   : > { %3466 = sst [smem:[#allocation7_spill]] %s2658_s17  ;;  %p2239_p7 = scmp.ge.s32.totalorder %s2533_s28, 1 }
  0x10   : > { %s3468_s19 = scalar_select %p2664_p6, 1, 0 }
  0x11   : > { %p407_p8 = scmp.lt.s32.totalorder %s2533_s28, 3 }
  0x12   : > { %3469 = sst [smem:[#allocation8_spill]] %s3468_s19 }
  0x13   : > { %p408_p9 = pnand %p2239_p7, %p407_p8 }
  0x14   : > { %p457_p10 = scmp.lt.s32.totalorder (!%p408_p9), %s2643_s29, 1  ;;  %s3470_s0 = sld [smem:[#allocation9_spill]] (!%p408_p9) }
  0x15   : > { %411 = sbr.rel (%p408_p9) target bundleno = 4728 (0x1278), region = 72  ;;  %s3471_s2 = sld [smem:[#allocation11_spill]] (!%p408_p9) }
  0x16   : > { %s3472_s1 = sld [smem:[#allocation10_spill]] (!%p408_p9)  ;;  %s3440_s30 = smov (!%p408_p9), 72  }
  0x17   : > { %s3473_s15 = smov (!%p408_p9), 8   ;;  %s3450_s22 = smov (!%p408_p9), 16  }
  0x18   : > { %s3454_s23 = smov (!%p408_p9), 88   ;;  %s3479_s27 = smov (!%p408_p9), 120  }
  0x19   : > { %s3480_s17 = smov (!%p408_p9), 56   ;;  %s3481_s14 = smov (!%p408_p9), 112  }
  0x1a   : > { %s458_s20 = scalar_select %p457_p10, %s2643_s29, 1  ;;  %vm480_vm0 = vcmask 523264   ;;  %v2538_v5 = vmov 64.0   ;;  %v515_v7 = vld [vmem:[%s3428_s4 + $0x38] sm:$0xff]  ;;  %v514_v8 = vld [vmem:[%s3428_s4 + $0x30] sm:$0xff]  ;;  %v513_v10 = vld [vmem:[%s3428_s4 + $0x28] sm:$0xff] }
  0x1b   : > { %2416 = vrcp.f32 %v2538_v5  ;;  %531 = vmatpush.msra.mxu0 %v515_v7  ;;  %v512_v11 = vld [vmem:[%s3428_s4 + $0x20] sm:$0xff]  ;;  %v511_v13 = vld [vmem:[%s3428_s4 + $0x18] sm:$0xff]  ;;  %v510_v14 = vld [vmem:[%s3428_s4 + $0x10] sm:$0xff]  ;;  %vm607_vm5 = vcmask 64512   ;;  %vm812_vm7 = vcmask 130048   ;;  %s3482_s19 = smov 104  }
  0x1c   : > { %s2240_s21 = sshll.u32 %s458_s20, 3  ;;  %s3438_s20 = smov 64   ;;  %v509_v15 = vld [vmem:[%s3428_s4 + $0x8] sm:$0xff]  ;;  %v508_v17 = vld [vmem:[%s3428_s4] sm:$0xff] }
  0x1d   : > { %s460_s24 = scalar_lea.vmem %s3470_s0, %s2240_s21  ;;  %s468_s16 = scalar_lea.vmem %s3471_s2, %s2240_s21  ;;  %532 = vmatpush.msra.mxu0 %v514_v8  ;;  %v2409_v29 = vld [vmem:[%s3427_s3] ss:$0 sm:$0xff] }
  0x1e   : > { %v2675_v0 = vld [vmem:[%s460_s24] sm:$0xff]  ;;  %s2690_s24 = scalar_lea.vmem %s3472_s1, %s2240_s21  ;;  %s3442_s0 = smov 8  }
  0x1f   : > { %v479_v1 = vmul.f32 %v2675_v0, %v2675_v0  ;;  %v2683_v3 = vld [vmem:[%s468_s16] sm:$0xff]  ;;  %533 = vmatpush.msra.mxu0 %v513_v10  ;;  %s3455_s21 = smov 120   ;;  %s3474_s16 = smov 64  }
  0x20   : > { %570 = vrot.lane.b32.xlu1 %v2683_v3, %s3438_s20  ;;  %v2693_v4 = vld [vmem:[%s2690_s24] sm:$0xff]  ;;  %580 = vrot.lane.b32.xlu2 %v2683_v3, %s3442_s0  ;;  %s3448_s1 = smov 32   ;;  %s3444_s2 = smov 104  }
  0x21   : > { %v481_v2 = vsel %vm480_vm0, %v479_v1, 0.0  ;;  %v2417_v6 = vpop.eup %2416  ;;  %534 = vmatpush.msra.mxu0 %v512_v11  ;;  %v2410_v33 = vld [vmem:[%s3429_s5] ss:$0 sm:$0xff] }
  0x22   : > { %482 = vadd.xlane.f32.xlu0 %v481_v2  ;;  %v485_v9 = vmul.f32 64.0, %v2417_v6  ;;  %vm489_vm1 = vweird.f32 %v2417_v6 }
  0x23   : > { %535 = vmatpush.msra.mxu0 %v511_v13 }
  0x24   : > { %v486_v12 = vsub.f32 1.0, %v485_v9 }
  0x25   : > { %536 = vmatpush.msra.mxu0 %v510_v14 }
  0x26   : > { %v487_v16 = vmul.f32 %v2417_v6, %v486_v12 }
  0x27   : > { %537 = vmatpush.msra.mxu0 %v509_v15 }
  0x28   : > { %552 = vrot.lane.b32.xlu1 %v2693_v4, %s3438_s20  ;;  %590 = vrot.lane.b32.xlu2 %v2693_v4, %s3442_s0  ;;  %v488_v18 = vadd.f32 %v2417_v6, %v487_v16  ;;  %s2541_s20 = smov 24   ;;  %s3449_s0 = smov 56  }
  0x29   : > { %538 = vmatpush.msra.mxu0 %v508_v17  ;;  %v472_v17 = vlaneseq }
  0x2a   : > { %v2729_v19 = vsel %vm489_vm1, %v2417_v6, %v488_v18 }
  0x2b   : > { %v473_v18 = vshrl.u32 %v472_v17, 7 }
  0x30   : > { %566 = vrot.lane.b32.xlu1 %v2693_v4, %s3440_s30 }
  0x36   : > { %557 = vrot.lane.b32.xlu0 %v2683_v3, %s3440_s30  ;;  %s3445_s30 = smov 112  }
  0x7a   : > { %v2744_v37 = vpop.permute.xlu2 %580 }
  0x82   : > { %v2760_v43 = vpop.permute.xlu2 %590 }
  0x92   : > { %v2746_v38 = vpop.permute.xlu1 %570 }
  0x95   : > { %v483_v20 = vpop.xlane.xlu0 %482 }
  0x96   : > { %v491_v21 = vmul.f32 %v2729_v19, %v483_v20  ;;  %v475_v20 = vand.u32 127, %v472_v17  ;;  %v543_v17 = vld [vmem:[%s3430_s6] sm:$0xff] }
  0x98   : > { %v492_v22 = vadd.f32 1e-06, %v491_v21  ;;  %vm2815_vm6 = vcmp.le.s32.totalorder %v475_v20, %v473_v18 }
  0x9a   : > { %2418 = vrsqrt.f32 %v492_v22  ;;  %vm499_vm3 = vweird.f32 %v492_v22  ;;  %v2762_v44 = vpop.permute.xlu1 %552 }
  0xa0   : > { %v2419_v23 = vpop.eup %2418 }
  0xa1   : > { %v494_v24 = vmul.f32 %v2419_v23, %v492_v22  ;;  %vm500_vm2 = vweird.f32 %v2419_v23 }
  0xa2   : > { %vm501_vm4 = vmor %vm499_vm3, %vm500_vm2  ;;  %v2772_v52 = vpop.permute.xlu1 %566 }
  0xa3   : > { %v495_v25 = vmul.f32 %v2419_v23, %v494_v24 }
  0xa5   : > { %v496_v26 = vmul.f32 0.5, %v495_v25 }
  0xa7   : > { %v497_v27 = vsub.f32 1.5, %v496_v26 }
  0xa8   : > { %v2740_v35 = vpop.permute.xlu0 %557 }
  0xa9   : > { %v498_v28 = vmul.f32 %v2419_v23, %v497_v27 }
  0xab   : > { %v502_v30 = vsel %vm501_vm4, %v2419_v23, %v498_v28 }
  0xac   : > { %v503_v31 = vmul.f32 %v502_v30, %v2675_v0 }
  0xae   : > { %v507_v32 = vmul.f32 %v2409_v29, %v503_v31 }
  0xb0   : > { %2243 = vmatmul.msk.f32.vlgmr.msra.gmra.mxu0 %vm480_vm0, %v507_v32 }
 0x12d   : > { %v540_v34 = vpop.f32.mrf.mxu0 }
 0x12e   : > { %v2742_v36 = vadd.f32 %v2410_v33, %v540_v34 }
 0x130   : > { %v560_v39 = vmul.f32 %v2740_v35, %v2742_v36  ;;  %v583_v40 = vmul.f32 %v2744_v37, %v2742_v36  ;;  %v573_v41 = vmul.f32 %v2746_v38, %v2742_v36  ;;  %v594_v42 = vmul.f32 %v2742_v36, %v2683_v3 }
 0x131   : > { %v555_v45 = vmul.f32 %v2762_v44, %v2742_v36  ;;  %v593_v48 = vmul.f32 %v2760_v43, %v2742_v36  ;;  %v569_v53 = vmul.f32 %v2772_v52, %v2742_v36  ;;  %v579_v57 = vmul.f32 %v2742_v36, %v2693_v4 }
 0x132   : > { %585 = vrot.lane.b32.xlu0 %v583_v40, %s3455_s21  ;;  %562 = vrot.lane.b32.xlu2 %v560_v39, %s3455_s21 }
 0x133   : > { %575 = vrot.lane.b32.xlu1 %v573_v41, %s3473_s15 }
 0x13a   : > { %596 = vrot.lane.b32.xlu2 %v594_v42, %s3473_s15 }
 0x18c   : > { %v563_v46 = vpop.permute.xlu2 %562 }
 0x18d   : > { %v565_v47 = vsub.f32 %v555_v45, %v563_v46 }
 0x18f   : > { %633 = vrot.lane.b32.xlu1 %v565_v47, %s3474_s16 }
 0x194   : > { %v597_v49 = vpop.permute.xlu2 %596 }
 0x195   : > { %v599_v50 = vadd.f32 %v597_v49, %v593_v48 }
 0x197   : > { %v600_v51 = vmul.f32 0.25, %v599_v50  ;;  %717 = vrot.lane.b32.xlu1 %v2683_v3, %s3450_s22 }
 0x199   : > { %602 = vrot.lane.b32.xlu0 %v600_v51, %s3455_s21 }
 0x19f   : > { %713 = vrot.lane.b32.xlu1 %v2693_v4, %s2541_s20 }
 0x1a4   : > { %v586_v56 = vpop.permute.xlu0 %585 }
 0x1a5   : > { %v576_v54 = vpop.permute.xlu1 %575  ;;  %v588_v58 = vsub.f32 %v579_v57, %v586_v56 }
 0x1a6   : > { %v578_v55 = vadd.f32 %v576_v54, %v569_v53 }
 0x1a7   : > { %699 = vrot.lane.b32.xlu1 %v2693_v4, %s3450_s22  ;;  %v589_v61 = vmul.f32 0.25, %v588_v58  ;;  %s3453_s22 = smov 96  }
 0x1a8   : > { %605 = vrot.lane.b32.xlu2 %v578_v55, %s3449_s0 }
 0x1b0   : > { %703 = vrot.lane.b32.xlu2 %v2683_v3, %s2541_s20  ;;  %s3446_s20 = smov 40  }
 0x201   : > { %v634_v59 = vpop.permute.xlu1 %633 }
 0x202   : > { %v606_v60 = vpop.permute.xlu2 %605  ;;  %2246 = vmatpush.xpose.msk.msra.mxu3 %vm607_vm5, %v634_v59 }
 0x203   : > { %2244 = vmatpush.xpose.msk.msra.mxu1 %vm607_vm5, %v606_v60 }
 0x205   : > { %2247 = vmatmul.msk.f32.vlgmr.msra.gmra.mxu3 %vm607_vm5, %v589_v61 }
 0x207   : > { %2251 = vmatpush.xpose.msk.msrb.mxu1 %vm607_vm5, %v634_v59 }
 0x209   : > { %v2787_v62 = vpop.permute.xlu1 %717 }
 0x20a   : > { %v720_v63 = vmul.f32 %v2787_v62, %v2742_v36  ;;  %v2793_v2 = vpop.permute.xlu2 %703 }
 0x20b   : > { %v603_v1 = vpop.permute.xlu0 %602  ;;  %v706_v5 = vmul.f32 %v2793_v2, %v2742_v36 }
 0x20c   : > { %722 = vrot.lane.b32.xlu2 %v720_v63, %s3473_s15  ;;  %2245 = vmatmul.msk.f32.vlgmr.msra.gmra.mxu1 %vm607_vm5, %v603_v1 }
 0x211   : > { %v2800_v6 = vpop.permute.xlu1 %713 }
 0x212   : > { %v716_v7 = vmul.f32 %v2800_v6, %v2742_v36 }
 0x214   : > { %708 = vrot.lane.b32.xlu2 %v706_v5, %s3455_s21 }
 0x219   : > { %v2804_v11 = vpop.permute.xlu1 %699 }
 0x21a   : > { %v702_v12 = vmul.f32 %v2804_v11, %v2742_v36 }
 0x21c   : > { %673 = vrot.lane.b32.xlu2 %v2742_v36, %s3448_s1 }
 0x266   : > { %v723_v8 = vpop.permute.xlu2 %722 }
 0x267   : > { %v725_v9 = vadd.f32 %v723_v8, %v716_v7 }
 0x269   : > { %v726_v10 = vmul.f32 0.25, %v725_v9 }
 0x26b   : > { %728 = vrot.lane.b32.xlu2 %v726_v10, %s3444_s2  ;;  %s3452_s2 = smov 80  }
 0x26e   : > { %v709_v13 = vpop.permute.xlu2 %708 }
 0x26f   : > { %v711_v14 = vsub.f32 %v702_v12, %v709_v13 }
 0x271   : > { %v712_v15 = vmul.f32 0.25, %v711_v14  ;;  %v544_v14 = vld [vmem:[%s3430_s6 + $0x8] sm:$0xff] }
 0x272   : > { %853 = vmatpush.msra.mxu1 %v544_v14 }
 0x273   : > { %753 = vrot.lane.b32.xlu2 %v712_v15, %s3445_s30  ;;  %s3447_s30 = smov 48  }
 0x274   : > { %854 = vmatpush.msra.mxu1 %v543_v17 }
 0x276   : > { %v674_v16 = vpop.permute.xlu2 %673 }
 0x277   : > { %694 = vmatpush.msrb.mxu3 %v674_v16  ;;  %807 = vmatpush.msra.mxu2 %v674_v16 }
 0x279   : > { %2249 = vmatpush.xpose.msk.msra.mxu3 %vm607_vm5, %v606_v60 }
 0x27b   : > { %903 = vrot.lane.b32.xlu2 %v2683_v3, %s3448_s1 }
 0x283   : > { %863 = vrot.lane.b32.xlu2 %v2683_v3, %s3454_s23 }
 0x288   : > { %v657_v21 = vpop.f32.mrf.mxu3 }
 0x289   : > { %v629_v22 = vpop.f32.mrf.mxu1 }
 0x28a   : > { %v658_v24 = vadd.f32 %v657_v21, %v629_v22 }
 0x28b   : > { %889 = vrot.lane.b32.xlu2 %v2683_v3, %s3446_s20 }
 0x28c   : > { %v660_v25 = vsel %vm2815_vm6, %v658_v24, -1e+30 }
 0x28d   : > { %v661_v26 = vsel %vm607_vm5, %v660_v25, -inf }
 0x28e   : > { %662 = vmax.xlane.f32.xlu0 %v661_v26 }
 0x293   : > { %1039 = vrot.lane.b32.xlu2 %v2683_v3, %s3449_s0 }
 0x2a2   : > { %876 = vrot.lane.b32.xlu0 %v2683_v3, %s3452_s2 }
 0x2aa   : > { %1053 = vrot.lane.b32.xlu0 %v2683_v3, %s3447_s30 }
 0x2b2   : > { %872 = vrot.lane.b32.xlu0 %v2693_v4, %s3454_s23 }
 0x2c5   : > { %v729_v27 = vpop.permute.xlu2 %728 }
 0x2cd   : > { %v754_v28 = vpop.permute.xlu2 %753 }
 0x2ce   : > { %2252 = vmatmul.msk.f32.vlgmr.msrb.gmra.mxu1 %vm607_vm5, %v754_v28 }
 0x2d5   : > { %v2833_v29 = vpop.permute.xlu2 %903 }
 0x2d6   : > { %v906_v30 = vmul.f32 %v2833_v29, %v2742_v36 }
 0x2d8   : > { %908 = vrot.lane.b32.xlu0 %v906_v30, %s3473_s15 }
 0x2dd   : > { %v2838_v31 = vpop.permute.xlu2 %863 }
 0x2de   : > { %v866_v47 = vmul.f32 %v2838_v31, %v2742_v36 }
 0x2e0   : > { %885 = vrot.lane.b32.xlu0 %v2693_v4, %s3448_s1 }
 0x2e5   : > { %v2842_v32 = vpop.permute.xlu2 %889 }
 0x2e6   : > { %v892_v33 = vmul.f32 %v2842_v32, %v2742_v36 }
 0x2e8   : > { %894 = vrot.lane.b32.xlu0 %v892_v33, %s3455_s21 }
 0x2ed   : > { %v2869_v50 = vpop.permute.xlu2 %1039 }
 0x2f0   : > { %1035 = vrot.lane.b32.xlu0 %v2693_v4, %s3447_s30 }
 0x301   : > { %v663_v34 = vpop.xlane.xlu0 %662 }
 0x302   : > { %v664_v39 = vsub.f32 %v660_v25, %v663_v34 }
 0x304   : > { %v665_v40 = vmul.f32 1.442695, %v664_v39 }
 0x306   : > { %2420 = vpow2.f32 %v665_v40 }
 0x30c   : > { %v2421_v41 = vpop.eup %2420 }
 0x30d   : > { %v667_v42 = vsel %vm607_vm5, %v2421_v41, 0.0 }
 0x30e   : > { %668 = vadd.xlane.f32.xlu1 %v667_v42 }
 0x314   : > { %v2850_v45 = vpop.permute.xlu0 %876 }
 0x315   : > { %v879_v46 = vmul.f32 %v2850_v45, %v2742_v36 }
 0x317   : > { %881 = vrot.lane.b32.xlu2 %v879_v46, %s3473_s15 }
 0x31c   : > { %v2862_v48 = vpop.permute.xlu0 %1053 }
 0x31d   : > { %v1056_v49 = vmul.f32 %v2862_v48, %v2742_v36 }
 0x31f   : > { %859 = vrot.lane.b32.xlu2 %v2693_v4, %s3452_s2 }
 0x324   : > { %v2871_v51 = vpop.permute.xlu0 %872 }
 0x325   : > { %v875_v53 = vmul.f32 %v2871_v51, %v2742_v36 }
 0x327   : > { %899 = vrot.lane.b32.xlu1 %v2693_v4, %s3446_s20  ;;  %868 = vrot.lane.b32.xlu2 %v866_v47, %s3455_s21 }
 0x32f   : > { %1049 = vrot.lane.b32.xlu1 %v2693_v4, %s3449_s0  ;;  %1058 = vrot.lane.b32.xlu2 %v1056_v49, %s3473_s15 }
 0x34a   : > { %v909_v10 = vpop.permute.xlu0 %908 }
 0x34b   : > { %v774_v21 = vpop.f32.mrf.mxu1 }
 0x352   : > { %v2890_v12 = vpop.permute.xlu0 %885 }
 0x353   : > { %v888_v34 = vmul.f32 %v2890_v12, %v2742_v36 }
 0x35a   : > { %v895_v13 = vpop.permute.xlu0 %894 }
 0x35b   : > { %v897_v39 = vsub.f32 %v888_v34, %v895_v13 }
 0x35d   : > { %v898_v40 = vmul.f32 0.25, %v897_v39 }
 0x362   : > { %v2895_v15 = vpop.permute.xlu0 %1035 }
 0x371   : > { %v882_v54 = vpop.permute.xlu2 %881 }
 0x372   : > { %v884_v55 = vadd.f32 %v882_v54, %v875_v53  ;;  %v1038_v53 = vmul.f32 %v2895_v15, %v2742_v36 }
 0x374   : > { %917 = vrot.lane.b32.xlu0 %v884_v55, %s3446_s20  ;;  %s3477_s20 = smov 72  }
 0x379   : > { %v2876_v56 = vpop.permute.xlu2 %859 }
 0x37a   : > { %v862_v57 = vmul.f32 %v2876_v56, %v2742_v36 }
 0x381   : > { %v669_v58 = vpop.xlane.xlu1 %668  ;;  %v869_v4 = vpop.permute.xlu2 %868 }
 0x382   : > { %2422 = vrcp.f32 %v669_v58  ;;  %v871_v59 = vsub.f32 %v862_v57, %v869_v4 }
 0x384   : > { %947 = vrot.lane.b32.xlu0 %v871_v59, %s3447_s30 }
 0x388   : > { %v2423_v60 = vpop.eup %2422 }
 0x389   : > { %v671_v61 = vmul.f32 %v2423_v60, %v2421_v41  ;;  %v1059_v7 = vpop.permute.xlu2 %1058  ;;  %v546_v60 = vld [vmem:[%s3430_s6 + $0x18] sm:$0xff] }
 0x38b   : > { %2248 = vmatmul.msk.f32.vlgmr.msrb.gmra.mxu3 %vm607_vm5, %v671_v61 }
 0x38c   : > { %830 = vmatpush.msrb.mxu3 %v546_v60 }
 0x393   : > { %2250 = vmatmul.msk.f32.vlgmr.msra.gmra.mxu3 %vm607_vm5, %v729_v27  ;;  %v1042_v27 = vmul.f32 %v2869_v50, %v2742_v36 }
 0x399   : > { %v2883_v63 = vpop.permute.xlu1 %899 }
 0x39a   : > { %v902_v28 = vmul.f32 %v2883_v63, %v2742_v36 }
 0x39c   : > { %v911_v30 = vadd.f32 %v909_v10, %v902_v28 }
 0x39e   : > { %v912_v33 = vmul.f32 0.25, %v911_v30 }
 0x3a1   : > { %v2885_v1 = vpop.permute.xlu1 %1049 }
 0x3a2   : > { %v1052_v5 = vmul.f32 %v2885_v1, %v2742_v36 }
 0x3a4   : > { %v1061_v8 = vadd.f32 %v1059_v7, %v1052_v5 }
 0x3a6   : > { %v1062_v9 = vmul.f32 0.25, %v1061_v8 }
 0x3a8   : > { %1064 = vrot.lane.b32.xlu0 %v1062_v9, %s3477_s20  ;;  %v545_v9 = vld [vmem:[%s3430_s6 + $0x10] sm:$0xff] }
 0x3a9   : > { %831 = vmatpush.msrb.mxu3 %v545_v9 }
 0x3e6   : > { %v918_v16 = vpop.permute.xlu0 %917 }
 0x3e7   : > { %2256 = vmatpush.xpose.msk.msrb.mxu2 %vm607_vm5, %v918_v16 }
 0x3f6   : > { %v948_v18 = vpop.permute.xlu0 %947 }
 0x3f7   : > { %2258 = vmatpush.xpose.msk.msrb.mxu0 %vm607_vm5, %v948_v18 }
 0x3fb   : > { %2264 = vmatpush.xpose.msk.msra.mxu0 %vm607_vm5, %v948_v18 }
 0x40e   : > { %v696_v20 = vpop.f32.mrf.mxu3 }
 0x40f   : > { %2255 = vmatmul.msk.f32.vlgmr.msra.gmra.mxu1 %vm812_vm7, %v696_v20 }
 0x416   : > { %v749_v22 = vpop.f32.mrf.mxu3 }
 0x417   : > { %v775_v24 = vadd.f32 %v774_v21, %v749_v22 }
 0x419   : > { %v777_v25 = vsel %vm2815_vm6, %v775_v24, -1e+30 }
 0x41a   : > { %v778_v26 = vsel %vm607_vm5, %v777_v25, -inf  ;;  %v1065_v8 = vpop.permute.xlu0 %1064 }
 0x41b   : > { %779 = vmax.xlane.f32.xlu1 %v778_v26 }
 0x434   : > { %1044 = vrot.lane.b32.xlu1 %v1042_v27, %s3455_s21  ;;  %s3483_s21 = smov 32  }
 0x43c   : > { %914 = vrot.lane.b32.xlu1 %v912_v33, %s3454_s23  ;;  %s3487_s23 = smov 96  }
 0x444   : > { %944 = vrot.lane.b32.xlu1 %v898_v40, %s3453_s22  ;;  %s3488_s22 = smov 80  }
 0x48e   : > { %v780_v41 = vpop.xlane.xlu1 %779 }
 0x48f   : > { %v781_v42 = vsub.f32 %v777_v25, %v780_v41 }
 0x491   : > { %v782_v46 = vmul.f32 1.442695, %v781_v42 }
 0x493   : > { %2424 = vpow2.f32 %v782_v46  ;;  %v548_v46 = vld [vmem:[%s3430_s6 + $0x28] sm:$0xff] }
 0x494   : > { %1028 = vmatpush.msrb.mxu1 %v548_v46 }
 0x499   : > { %v2425_v47 = vpop.eup %2424 }
 0x49a   : > { %v784_v49 = vsel %vm607_vm5, %v2425_v47, 0.0 }
 0x49b   : > { %785 = vadd.xlane.f32.xlu2 %v784_v49 }
 0x4a6   : > { %v1045_v54 = vpop.permute.xlu1 %1044 }
 0x4a7   : > { %v1047_v55 = vsub.f32 %v1038_v53, %v1045_v54 }
 0x4a9   : > { %v1048_v57 = vmul.f32 0.25, %v1047_v55 }
 0x4ab   : > { %1089 = vrot.lane.b32.xlu1 %v1048_v57, %s3452_s2  ;;  %s3478_s2 = smov 16  }
 0x4ae   : > { %v915_v58 = vpop.permute.xlu1 %914 }
 0x4b6   : > { %v945_v4 = vpop.permute.xlu1 %944 }
 0x4b7   : > { %2259 = vmatmul.msk.f32.vlgmr.msrb.gmra.mxu0 %vm607_vm5, %v945_v4  ;;  %v550_v4 = vld [vmem:[%s3430_s6 + $0x38] sm:$0xff] }
 0x50e   : > { %v786_v59 = vpop.xlane.xlu2 %785 }
 0x50f   : > { %2426 = vrcp.f32 %v786_v59  ;;  %v549_v59 = vld [vmem:[%s3430_s6 + $0x30] sm:$0xff] }
 0x515   : > { %v2427_v61 = vpop.eup %2426 }
 0x516   : > { %v788_v5 = vmul.f32 %v2427_v61, %v2425_v47 }
 0x518   : > { %2253 = vmatmul.msk.f32.vlgmr.msra.gmra.mxu2 %vm607_vm5, %v788_v5 }
 0x519   : > { %2262 = vmatpush.xpose.msk.msra.mxu2 %vm607_vm5, %v918_v16 }
 0x51d   : > { %v1090_v7 = vpop.permute.xlu1 %1089 }
 0x51e   : > { %2265 = vmatmul.msk.f32.vlgmr.msra.gmra.mxu0 %vm607_vm5, %v1090_v7  ;;  %v856_v7 = vpop.f32.mrf.mxu1 }
 0x520   : > { %2257 = vmatmul.msk.f32.vlgmr.msrb.gmra.mxu2 %vm607_vm5, %v915_v58 }
 0x528   : > { %2263 = vmatmul.msk.f32.vlgmr.msra.gmra.mxu2 %vm607_vm5, %v1065_v8 }
 0x534   : > { %v970_v13 = vpop.f32.mrf.mxu0 }
 0x59b   : > { %v809_v10 = vpop.f32.mrf.mxu2  ;;  %v1110_v20 = vpop.f32.mrf.mxu0 }
 0x59c   : > { %2254 = vmatmul.msk.f32.vlgmr.msrb.gmra.mxu3 %vm812_vm7, %v809_v10 }
 0x5a3   : > { %v940_v14 = vpop.f32.mrf.mxu2 }
 0x5a4   : > { %v971_v17 = vadd.f32 %v970_v13, %v940_v14 }
 0x5a6   : > { %v973_v16 = vsel %vm2815_vm6, %v971_v17, -1e+30 }
 0x5a7   : > { %v974_v18 = vsel %vm607_vm5, %v973_v16, -inf }
 0x5a8   : > { %975 = vmax.xlane.f32.xlu0 %v974_v18 }
 0x5ab   : > { %v1085_v21 = vpop.f32.mrf.mxu2 }
 0x5ac   : > { %v1111_v22 = vadd.f32 %v1110_v20, %v1085_v21  ;;  %v1209_v20 = vld [vmem:[%s3432_s8 + $0x70] sm:$0xff]  ;;  %v1210_v21 = vld [vmem:[%s3432_s8 + $0x78] sm:$0xff] }
 0x5ad   : > { %1222 = vmatpush.msrb.mxu2 %v1209_v20  ;;  %1242 = vmatpush.msrb.mxu0 %v1210_v21  ;;  %v1281_v20 = vld [vmem:[%s3433_s9 + $0x30] sm:$0xff]  ;;  %v1280_v21 = vld [vmem:[%s3433_s9 + $0x28] sm:$0xff] }
 0x5ae   : > { %v1113_v24 = vsel %vm2815_vm6, %v1111_v22, -1e+30  ;;  %v1208_v22 = vld [vmem:[%s3432_s8 + $0x68] sm:$0xff] }
 0x5af   : > { %v1114_v25 = vsel %vm607_vm5, %v1113_v24, -inf  ;;  %1243 = vmatpush.msrb.mxu0 %v1208_v22  ;;  %v1278_v22 = vld [vmem:[%s3433_s9 + $0x18] sm:$0xff] }
 0x5b0   : > { %1115 = vmax.xlane.f32.xlu1 %v1114_v25  ;;  %v1206_v25 = vld [vmem:[%s3432_s8 + $0x58] sm:$0xff] }
 0x5b1   : > { %1244 = vmatpush.msrb.mxu0 %v1206_v25  ;;  %v1276_v25 = vld [vmem:[%s3433_s9 + $0x8] sm:$0xff] }
 0x61b   : > { %v976_v26 = vpop.xlane.xlu0 %975 }
 0x61c   : > { %v977_v27 = vsub.f32 %v973_v16, %v976_v26  ;;  %v1203_v26 = vld [vmem:[%s3432_s8 + $0x40] sm:$0xff] }
 0x61e   : > { %v978_v28 = vmul.f32 1.442695, %v977_v27  ;;  %v1204_v27 = vld [vmem:[%s3432_s8 + $0x48] sm:$0xff] }
 0x61f   : > { %v833_v60 = vpop.f32.mrf.mxu3  ;;  %1245 = vmatpush.msrb.mxu0 %v1204_v27 }
 0x620   : > { %2428 = vpow2.f32 %v978_v28  ;;  %v857_v9 = vadd.f32 %v856_v7, %v833_v60  ;;  %v1201_v28 = vld [vmem:[%s3432_s8 + $0x30] sm:$0xff] }
 0x621   : > { %v1289_v7 = vld [vmem:[%s3433_s9 + $0x70] sm:$0xff] }
 0x623   : > { %v1116_v30 = vpop.xlane.xlu1 %1115 }
 0x624   : > { %v1117_v33 = vsub.f32 %v1113_v24, %v1116_v30  ;;  %v1205_v24 = vld [vmem:[%s3432_s8 + $0x50] sm:$0xff]  ;;  %v1202_v30 = vld [vmem:[%s3432_s8 + $0x38] sm:$0xff] }
 0x625   : > { %1246 = vmatpush.msrb.mxu0 %v1202_v30 }
 0x626   : > { %v2429_v34 = vpop.eup %2428  ;;  %v1118_v39 = vmul.f32 1.442695, %v1117_v33  ;;  %v1199_v33 = vld [vmem:[%s3432_s8 + $0x20] sm:$0xff] }
 0x627   : > { %v980_v40 = vsel %vm607_vm5, %v2429_v34, 0.0 }
 0x628   : > { %2430 = vpow2.f32 %v1118_v39  ;;  %981 = vadd.xlane.f32.xlu2 %v980_v40  ;;  %v1197_v39 = vld [vmem:[%s3432_s8 + $0x10] sm:$0xff]  ;;  %v1198_v40 = vld [vmem:[%s3432_s8 + $0x18] sm:$0xff] }
 0x62e   : > { %v2431_v41 = vpop.eup %2430 }
 0x62f   : > { %v1120_v42 = vsel %vm607_vm5, %v2431_v41, 0.0 }
 0x630   : > { %1121 = vadd.xlane.f32.xlu2 %v1120_v42  ;;  %v1196_v42 = vld [vmem:[%s3432_s8 + $0x8] sm:$0xff] }
 0x648   : > { %985 = vrot.lane.b32.xlu2 %v2742_v36, %s3478_s2  ;;  %v547_v36 = vld [vmem:[%s3430_s6 + $0x20] sm:$0xff] }
 0x649   : > { %1029 = vmatpush.msrb.mxu1 %v547_v36 }
 0x64b   : > { %1165 = vmatpush.msra.mxu1 %v550_v4  ;;  %v2411_v4 = vld [vmem:[%s3431_s7] ss:$0 sm:$0xff] }
 0x64d   : > { %1166 = vmatpush.msra.mxu1 %v549_v59 }
 0x69b   : > { %v982_v47 = vpop.xlane.xlu2 %981 }
 0x69c   : > { %2432 = vrcp.f32 %v982_v47 }
 0x6a2   : > { %v2433_v53 = vpop.eup %2432 }
 0x6a3   : > { %v1122_v49 = vpop.xlane.xlu2 %1121  ;;  %v984_v54 = vmul.f32 %v2433_v53, %v2429_v34  ;;  %v1200_v34 = vld [vmem:[%s3432_s8 + $0x28] sm:$0xff] }
 0x6a4   : > { %2434 = vrcp.f32 %v1122_v49  ;;  %1247 = vmatpush.msrb.mxu0 %v1200_v34 }
 0x6a6   : > { %1248 = vmatpush.msrb.mxu0 %v1198_v40 }
 0x6a8   : > { %1249 = vmatpush.msrb.mxu0 %v1196_v42 }
 0x6aa   : > { %v2435_v57 = vpop.eup %2434 }
 0x6ab   : > { %v986_v55 = vpop.permute.xlu2 %985  ;;  %v1124_v58 = vmul.f32 %v2435_v57, %v2431_v41  ;;  %v1195_v41 = vld [vmem:[%s3432_s8] sm:$0xff] }
 0x6ac   : > { %1006 = vmatpush.msra.mxu3 %v986_v55 }
 0x6ad   : > { %2260 = vmatmul.msk.f32.vlgmr.msra.gmra.mxu3 %vm607_vm5, %v984_v54 }
 0x6ae   : > { %1143 = vmatpush.msrb.mxu3 %v986_v55 }
 0x6b5   : > { %2266 = vmatmul.msk.f32.vlgmr.msrb.gmra.mxu3 %vm607_vm5, %v1124_v58 }
 0x730   : > { %v1008_v61 = vpop.f32.mrf.mxu3 }
 0x731   : > { %2261 = vmatmul.msk.f32.vlgmr.msrb.gmra.mxu1 %vm812_vm7, %v1008_v61 }
 0x738   : > { %v1145_v5 = vpop.f32.mrf.mxu3 }
 0x739   : > { %2267 = vmatmul.msk.f32.vlgmr.msra.gmra.mxu1 %vm812_vm7, %v1145_v5  ;;  %v1290_v5 = vld [vmem:[%s3433_s9 + $0x78] sm:$0xff] }
 0x73a   : > { %1291 = vmatpush.msra.mxu3 %v1290_v5  ;;  %v2278_v5 = vld [vmem:[%s3428_s4 + $0x70] sm:$0xff] }
 0x73c   : > { %1292 = vmatpush.msra.mxu3 %v1289_v7  ;;  %v2276_v7 = vld [vmem:[%s3428_s4 + $0x60] sm:$0xff] }
 0x7ae   : > { %v1031_v8 = vpop.f32.mrf.mxu1 }
 0x7af   : > { %v1034_v10 = vadd.f32 %v1031_v8, %v857_v9  ;;  %v1288_v8 = vld [vmem:[%s3433_s9 + $0x68] sm:$0xff]  ;;  %v1287_v9 = vld [vmem:[%s3433_s9 + $0x60] sm:$0xff] }
 0x7b0   : > { %1293 = vmatpush.msra.mxu3 %v1288_v8  ;;  %v2275_v8 = vld [vmem:[%s3428_s4 + $0x58] sm:$0xff] }
 0x7b2   : > { %1294 = vmatpush.msra.mxu3 %v1287_v9  ;;  %v2274_v9 = vld [vmem:[%s3428_s4 + $0x50] sm:$0xff] }
 0x7b6   : > { %v1168_v13 = vpop.f32.mrf.mxu1 }
 0x7b7   : > { %v1171_v14 = vadd.f32 %v1168_v13, %v1034_v10  ;;  %v1286_v10 = vld [vmem:[%s3433_s9 + $0x58] sm:$0xff]  ;;  %v1285_v13 = vld [vmem:[%s3433_s9 + $0x50] sm:$0xff] }
 0x7b8   : > { %1295 = vmatpush.msra.mxu3 %v1286_v10  ;;  %v2273_v10 = vld [vmem:[%s3428_s4 + $0x48] sm:$0xff] }
 0x7b9   : > { %v2960_v17 = vadd.f32 %v1171_v14, %v2675_v0  ;;  %v1207_v0 = vld [vmem:[%s3432_s8 + $0x60] sm:$0xff]  ;;  %v1284_v14 = vld [vmem:[%s3433_s9 + $0x48] sm:$0xff] }
 0x7ba   : > { %1223 = vmatpush.msrb.mxu2 %v1207_v0  ;;  %1296 = vmatpush.msra.mxu3 %v1285_v13  ;;  %v1279_v0 = vld [vmem:[%s3433_s9 + $0x20] sm:$0xff] }
 0x7bb   : > { %v1174_v16 = vmul.f32 %v2960_v17, %v2960_v17  ;;  %v2272_v13 = vld [vmem:[%s3428_s4 + $0x40] sm:$0xff] }
 0x7bc   : > { %1224 = vmatpush.msrb.mxu2 %v1205_v24  ;;  %1297 = vmatpush.msra.mxu3 %v1284_v14  ;;  %v1277_v24 = vld [vmem:[%s3433_s9 + $0x10] sm:$0xff] }
 0x7bd   : > { %v1175_v18 = vsel %vm480_vm0, %v1174_v16, 0.0  ;;  %v1283_v16 = vld [vmem:[%s3433_s9 + $0x40] sm:$0xff] }
 0x7be   : > { %1176 = vadd.xlane.f32.xlu0 %v1175_v18  ;;  %1225 = vmatpush.msrb.mxu2 %v1203_v26  ;;  %v1282_v18 = vld [vmem:[%s3433_s9 + $0x38] sm:$0xff]  ;;  %v1275_v26 = vld [vmem:[%s3433_s9] sm:$0xff] }
 0x7bf   : > { %1298 = vmatpush.msra.mxu3 %v1283_v16 }
 0x7c0   : > { %1226 = vmatpush.msrb.mxu2 %v1201_v28 }
 0x7c1   : > { %1299 = vmatpush.msra.mxu3 %v1282_v18 }
 0x7c2   : > { %1227 = vmatpush.msrb.mxu2 %v1199_v33 }
 0x7c3   : > { %1300 = vmatpush.msra.mxu3 %v1281_v20 }
 0x7c4   : > { %1228 = vmatpush.msrb.mxu2 %v1197_v39 }
 0x7c5   : > { %1301 = vmatpush.msra.mxu3 %v1280_v21 }
 0x7c6   : > { %1229 = vmatpush.msrb.mxu2 %v1195_v41 }
 0x7c7   : > { %1302 = vmatpush.msra.mxu3 %v1279_v0 }
 0x7c9   : > { %1303 = vmatpush.msra.mxu3 %v1278_v22 }
 0x7cb   : > { %1304 = vmatpush.msra.mxu3 %v1277_v24 }
 0x7cd   : > { %1305 = vmatpush.msra.mxu3 %v1276_v25 }
 0x7cf   : > { %1306 = vmatpush.msra.mxu3 %v1275_v26  ;;  %v2412_v26 = vld [vmem:[%s3427_s3 + $0x1] ss:$0 sm:$0xff] }
 0x831   : > { %v1177_v46 = vpop.xlane.xlu0 %1176 }
 0x832   : > { %v1178_v47 = vmul.f32 %v1177_v46, %v2729_v19 }
 0x834   : > { %v1179_v49 = vadd.f32 1e-06, %v1178_v47 }
 0x836   : > { %2436 = vrsqrt.f32 %v1179_v49  ;;  %vm1186_vm9 = vweird.f32 %v1179_v49 }
 0x83c   : > { %v2437_v53 = vpop.eup %2436 }
 0x83d   : > { %v1181_v54 = vmul.f32 %v2437_v53, %v1179_v49  ;;  %vm1187_vm8 = vweird.f32 %v2437_v53 }
 0x83e   : > { %vm1188_vm10 = vmor %vm1186_vm9, %vm1187_vm8 }
 0x83f   : > { %v1182_v55 = vmul.f32 %v2437_v53, %v1181_v54 }
 0x841   : > { %v1183_v57 = vmul.f32 0.5, %v1182_v55 }
 0x843   : > { %v1184_v58 = vsub.f32 1.5, %v1183_v57 }
 0x845   : > { %v1185_v36 = vmul.f32 %v2437_v53, %v1184_v58 }
 0x847   : > { %v1189_v59 = vsel %vm1188_vm10, %v2437_v53, %v1185_v36 }
 0x848   : > { %v1190_v60 = vmul.f32 %v1189_v59, %v2960_v17 }
 0x84a   : > { %v1194_v61 = vmul.f32 %v2411_v4, %v1190_v60 }
 0x84c   : > { %2268 = vmatmul.msk.f32.vlgmr.msrb.gmra.mxu2 %vm480_vm0, %v1194_v61  ;;  %2269 = vmatmul.msk.f32.vlgmr.msrb.gmra.mxu0 %vm480_vm0, %v1194_v61  ;;  %v2279_v61 = vld [vmem:[%s3428_s4 + $0x78] sm:$0xff] }
 0x84d   : > { %1359 = vmatpush.msrb.mxu1 %v2279_v61 }
 0x84f   : > { %1360 = vmatpush.msrb.mxu1 %v2278_v5 }
 0x8c9   : > { %v1251_v57 = vpop.f32.mrf.mxu0 }
 0x8cf   : > { %v1231_v27 = vpop.f32.mrf.mxu2 }
 0x8d0   : > { %v2270_v28 = vmul.f32 -1.442695, %v1231_v27 }
 0x8d2   : > { %2438 = vpow2.f32 %v2270_v28 }
 0x8d8   : > { %v2439_v30 = vpop.eup %2438 }
 0x8d9   : > { %v1257_v33 = vadd.f32 1.0, %v2439_v30 }
 0x8db   : > { %2440 = vrcp.f32 %v1257_v33  ;;  %v1269_v41 = vand.u32 2147483648, %v1257_v33  ;;  %v1267_v46 = vand.u32 2147483647, %v1257_v33  ;;  %vm1263_vm12 = vweird.f32 %v1257_v33 }
 0x8dd   : > { %v1270_v49 = vor.u32 1.1754944e-38, %v1269_v41  ;;  %vm1268_vm14 = vcmp.eq.f32.partialorder %v1267_v46, 8.507059e+37 }
 0x8e1   : > { %v2441_v34 = vpop.eup %2440 }
 0x8e2   : > { %v1259_v39 = vmul.f32 %v2441_v34, %v1257_v33  ;;  %vm1264_vm11 = vweird.f32 %v2441_v34  ;;  %v2413_v33 = vld [vmem:[%s3429_s5 + $0x1] ss:$0 sm:$0xff] }
 0x8e3   : > { %vm1265_vm13 = vmor %vm1263_vm12, %vm1264_vm11 }
 0x8e4   : > { %v1260_v40 = vsub.f32 1.0, %v1259_v39 }
 0x8e6   : > { %v1261_v42 = vmul.f32 %v2441_v34, %v1260_v40 }
 0x8e8   : > { %v1262_v47 = vadd.f32 %v2441_v34, %v1261_v42 }
 0x8ea   : > { %v1266_v53 = vsel %vm1265_vm13, %v2441_v34, %v1262_v47 }
 0x8eb   : > { %v1271_v54 = vsel %vm1268_vm14, %v1270_v49, %v1266_v53  ;;  %vm2142_vm14 = vcmask 253952  }
 0x8ec   : > { %v1273_v55 = vmul.f32 %v1271_v54, %v1231_v27 }
 0x8ee   : > { %v1274_v58 = vmul.f32 %v1273_v55, %v1251_v57 }
 0x8f0   : > { %1307 = vmatmul.f32.vlgmr.msra.gmra.mxu3 %v1274_v58 }
 0x973   : > { %v1308_v36 = vpop.f32.mrf.mxu3 }
 0x974   : > { %v3069_v4 = vadd.f32 %v1308_v36, %v2960_v17  ;;  %v2277_v17 = vld [vmem:[%s3428_s4 + $0x68] sm:$0xff] }
 0x975   : > { %1361 = vmatpush.msrb.mxu1 %v2277_v17 }
 0x976   : > { %v1313_v59 = vmul.f32 %v3069_v4, %v3069_v4 }
 0x977   : > { %1362 = vmatpush.msrb.mxu1 %v2276_v7 }
 0x978   : > { %v1314_v60 = vsel %vm480_vm0, %v1313_v59, 0.0 }
 0x979   : > { %1315 = vadd.xlane.f32.xlu1 %v1314_v60  ;;  %1363 = vmatpush.msrb.mxu1 %v2275_v8  ;;  %v2470_v8 = vld [vmem:[%s2690_s24] sm:$0xff]  ;;  %s3484_s24 = smov 40  }
 0x97b   : > { %1364 = vmatpush.msrb.mxu1 %v2274_v9 }
 0x97d   : > { %1365 = vmatpush.msrb.mxu1 %v2273_v10 }
 0x97f   : > { %1366 = vmatpush.msrb.mxu1 %v2272_v13 }
 0x9ec   : > { %v1316_v14 = vpop.xlane.xlu1 %1315 }
 0x9ed   : > { %v1317_v16 = vmul.f32 %v1316_v14, %v2729_v19 }
 0x9ef   : > { %v1318_v18 = vadd.f32 1e-06, %v1317_v16 }
 0x9f1   : > { %2442 = vrsqrt.f32 %v1318_v18  ;;  %vm1325_vm1 = vweird.f32 %v1318_v18 }
 0x9f7   : > { %v2443_v20 = vpop.eup %2442 }
 0x9f8   : > { %v1320_v21 = vmul.f32 %v2443_v20, %v1318_v18  ;;  %vm1326_vm15 = vweird.f32 %v2443_v20 }
 0x9f9   : > { %vm1327_vm2 = vmor %vm1325_vm1, %vm1326_vm15 }
 0x9fa   : > { %v1321_v0 = vmul.f32 %v2443_v20, %v1320_v21 }
 0x9fc   : > { %v1322_v22 = vmul.f32 0.5, %v1321_v0 }
 0x9fe   : > { %v1323_v24 = vsub.f32 1.5, %v1322_v22 }
 0xa00   : > { %v1324_v25 = vmul.f32 %v2443_v20, %v1323_v24 }
 0xa02   : > { %v1328_v27 = vsel %vm1327_vm2, %v2443_v20, %v1324_v25 }
 0xa03   : > { %v1329_v28 = vmul.f32 %v1328_v27, %v3069_v4 }
 0xa05   : > { %v1333_v30 = vmul.f32 %v2412_v26, %v1329_v28 }
 0xa07   : > { %2281 = vmatmul.msk.f32.vlgmr.msrb.gmra.mxu1 %vm480_vm0, %v1333_v30 }
 0xa84   : > { %v1368_v34 = vpop.f32.mrf.mxu1 }
 0xa85   : > { %v3107_v39 = vadd.f32 %v2413_v33, %v1368_v34 }
 0xa87   : > { %v1403_v40 = vmul.f32 %v3107_v39, %v2683_v3  ;;  %v1388_v41 = vmul.f32 %v3107_v39, %v2746_v38  ;;  %v1381_v42 = vmul.f32 %v3107_v39, %v2740_v35  ;;  %v1508_v46 = vmul.f32 %v3107_v39, %v2793_v2 }
 0xa88   : > { %v1516_v47 = vmul.f32 %v3107_v39, %v2787_v62  ;;  %v1395_v3 = vmul.f32 %v3107_v39, %v2744_v37  ;;  %v1402_v38 = vmul.f32 %v3107_v39, %v2760_v43  ;;  %v1387_v49 = vmul.f32 %v3107_v39, %v2772_v52 }
 0xa89   : > { %1405 = vrot.lane.b32.xlu1 %v1403_v40, %s3473_s15  ;;  %1390 = vrot.lane.b32.xlu0 %v1388_v41, %s3473_s15  ;;  %v1515_v37 = vmul.f32 %v3107_v39, %v2800_v6  ;;  %v1380_v58 = vmul.f32 %v3107_v39, %v2762_v44  ;;  %v1507_v52 = vmul.f32 %v3107_v39, %v2804_v11 }
 0xa8a   : > { %1383 = vrot.lane.b32.xlu2 %v1381_v42, %s3479_s27  ;;  %v1662_v6 = vmul.f32 %v3107_v39, %v2850_v45  ;;  %v1677_v44 = vmul.f32 %v3107_v39, %v2833_v29  ;;  %v1655_v11 = vmul.f32 %v3107_v39, %v2838_v31  ;;  %v1669_v17 = vmul.f32 %v3107_v39, %v2842_v32 }
 0xa8b   : > { %v1815_v45 = vmul.f32 %v3107_v39, %v2862_v48  ;;  %v1394_v31 = vmul.f32 %v2470_v8, %v3107_v39  ;;  %v1807_v34 = vmul.f32 %v3107_v39, %v2869_v50  ;;  %v1661_v40 = vmul.f32 %v3107_v39, %v2871_v51 }
 0xa8c   : > { %v1654_v42 = vmul.f32 %v3107_v39, %v2876_v56 }
 0xa91   : > { %1510 = vrot.lane.b32.xlu0 %v1508_v46, %s3479_s27 }
 0xa92   : > { %1518 = vrot.lane.b32.xlu2 %v1516_v47, %s3473_s15 }
 0xa99   : > { %1397 = vrot.lane.b32.xlu0 %v1395_v3, %s3479_s27  ;;  %v1676_v3 = vmul.f32 %v3107_v39, %v2883_v63 }
 0xae4   : > { %v1384_v35 = vpop.permute.xlu2 %1383 }
 0xae5   : > { %v1386_v59 = vsub.f32 %v1380_v58, %v1384_v35 }
 0xaec   : > { %v1519_v57 = vpop.permute.xlu2 %1518 }
 0xaed   : > { %v1521_v43 = vadd.f32 %v1519_v57, %v1515_v37 }
 0xaef   : > { %v1522_v61 = vmul.f32 0.25, %v1521_v43 }
 0xafb   : > { %v1406_v2 = vpop.permute.xlu1 %1405  ;;  %v1391_v53 = vpop.permute.xlu0 %1390 }
 0xafc   : > { %v1408_v54 = vadd.f32 %v1406_v2, %v1402_v38  ;;  %v1393_v62 = vadd.f32 %v1391_v53, %v1387_v49  ;;  %v1668_v49 = vmul.f32 %v3107_v39, %v2890_v12 }
 0xafe   : > { %v1409_v55 = vmul.f32 0.25, %v1408_v54  ;;  %1414 = vrot.lane.b32.xlu2 %v1393_v62, %s3480_s17 }
 0xb00   : > { %1411 = vrot.lane.b32.xlu1 %v1409_v55, %s3479_s27 }
 0xb03   : > { %v1511_v36 = vpop.permute.xlu0 %1510 }
 0xb04   : > { %v1513_v60 = vsub.f32 %v1507_v52, %v1511_v36 }
 0xb06   : > { %v1514_v5 = vmul.f32 0.25, %v1513_v60  ;;  %1441 = vrot.lane.b32.xlu2 %v1386_v59, %s3474_s16  ;;  %s3486_s16 = smov 88   ;;  %v1806_v59 = vmul.f32 %v3107_v39, %v2895_v15  ;;  %v2283_v15 = vld [vmem:[%s3430_s6 + $0x48] sm:$0xff] }
 0xb08   : > { %1549 = vrot.lane.b32.xlu0 %v1514_v5, %s3481_s14  ;;  %1524 = vrot.lane.b32.xlu1 %v1522_v61, %s3482_s19 }
 0xb0b   : > { %v1398_v29 = vpop.permute.xlu0 %1397 }
 0xb0c   : > { %v1400_v9 = vsub.f32 %v1394_v31, %v1398_v29 }
 0xb0e   : > { %v1401_v32 = vmul.f32 0.25, %v1400_v9 }
 0xb10   : > { %1664 = vrot.lane.b32.xlu0 %v1662_v6, %s3473_s15  ;;  %1481 = vrot.lane.b32.xlu1 %v3107_v39, %s3483_s21  ;;  %v1814_v6 = vmul.f32 %v3107_v39, %v2885_v1 }
 0xb18   : > { %1679 = vrot.lane.b32.xlu0 %v1677_v44, %s3473_s15 }
 0xb20   : > { %1657 = vrot.lane.b32.xlu0 %v1655_v11, %s3479_s27 }
 0xb28   : > { %1671 = vrot.lane.b32.xlu0 %v1669_v17, %s3479_s27 }
 0xb30   : > { %1817 = vrot.lane.b32.xlu0 %v1815_v45, %s3473_s15  ;;  %s3485_s15 = smov 48  }
 0xb58   : > { %v1415_v7 = vpop.permute.xlu2 %1414 }
 0xb59   : > { %2290 = vmatpush.xpose.msk.msra.mxu2 %vm607_vm5, %v1415_v7 }
 0xb5d   : > { %2295 = vmatpush.xpose.msk.msrb.mxu2 %vm607_vm5, %v1415_v7 }
 0xb60   : > { %v1442_v10 = vpop.permute.xlu2 %1441 }
 0xb61   : > { %2292 = vmatpush.xpose.msk.msra.mxu0 %vm607_vm5, %v1442_v10 }
 0xb64   : > { %2293 = vmatmul.msk.f32.vlgmr.msra.gmra.mxu0 %vm607_vm5, %v1401_v32 }
 0xb65   : > { %2297 = vmatpush.xpose.msk.msrb.mxu0 %vm607_vm5, %v1442_v10 }
 0xb69   : > { %1648 = vmatpush.msra.mxu0 %v2283_v15  ;;  %v2323_v15 = vld [vmem:[%s3432_s8 + $0xc0] sm:$0xff] }
 0xb72   : > { %v1412_v48 = vpop.permute.xlu1 %1411 }
 0xb73   : > { %2291 = vmatmul.msk.f32.vlgmr.msra.gmra.mxu2 %vm607_vm5, %v1412_v48  ;;  %v2282_v48 = vld [vmem:[%s3430_s6 + $0x40] sm:$0xff] }
 0xb74   : > { %1649 = vmatpush.msra.mxu0 %v2282_v48  ;;  %v2316_v48 = vld [vmem:[%s3432_s8 + $0x88] sm:$0xff] }
 0xb7a   : > { %v1550_v13 = vpop.permute.xlu0 %1549  ;;  %v1525_v14 = vpop.permute.xlu1 %1524 }
 0xb7b   : > { %2296 = vmatmul.msk.f32.vlgmr.msrb.gmra.mxu2 %vm607_vm5, %v1525_v14  ;;  %2298 = vmatmul.msk.f32.vlgmr.msrb.gmra.mxu0 %vm607_vm5, %v1550_v13  ;;  %v2285_v13 = vld [vmem:[%s3430_s6 + $0x58] sm:$0xff]  ;;  %v2284_v14 = vld [vmem:[%s3430_s6 + $0x50] sm:$0xff] }
 0xb7c   : > { %1625 = vmatpush.msra.mxu2 %v2285_v13 }
 0xb7e   : > { %1626 = vmatpush.msra.mxu2 %v2284_v14 }
 0xb82   : > { %v1482_v16 = vpop.permute.xlu1 %1481  ;;  %v1665_v30 = vpop.permute.xlu0 %1664 }
 0xb83   : > { %1502 = vmatpush.msra.mxu1 %v1482_v16  ;;  %v1667_v46 = vadd.f32 %v1665_v30, %v1661_v40 }
 0xb85   : > { %1603 = vmatpush.msrb.mxu1 %v1482_v16 }
 0xb8a   : > { %v1680_v33 = vpop.permute.xlu0 %1679 }
 0xb8b   : > { %v1682_v35 = vadd.f32 %v1680_v33, %v1676_v3 }
 0xb8d   : > { %v1683_v50 = vmul.f32 0.25, %v1682_v35 }
 0xb92   : > { %v1658_v41 = vpop.permute.xlu0 %1657 }
 0xb93   : > { %v1660_v47 = vsub.f32 %v1654_v42, %v1658_v41 }
 0xb9a   : > { %v1672_v38 = vpop.permute.xlu0 %1671 }
 0xb9b   : > { %v1674_v51 = vsub.f32 %v1668_v49, %v1672_v38 }
 0xb9d   : > { %v1675_v2 = vmul.f32 0.25, %v1674_v51 }
 0xba2   : > { %v1818_v5 = vpop.permute.xlu0 %1817 }
 0xba3   : > { %v1820_v44 = vadd.f32 %v1818_v5, %v1814_v6  ;;  %v2329_v6 = vld [vmem:[%s3432_s8 + $0xf0] sm:$0xff] }
 0xba5   : > { %v1821_v11 = vmul.f32 0.25, %v1820_v44  ;;  %v2330_v44 = vld [vmem:[%s3432_s8 + $0xf8] sm:$0xff] }
 0xbe1   : > { %v1465_v18 = vpop.f32.mrf.mxu0 }
 0xbf6   : > { %v1437_v20 = vpop.f32.mrf.mxu2 }
 0xbf7   : > { %v1466_v21 = vadd.f32 %v1465_v18, %v1437_v20 }
 0xbf8   : > { %v1570_v24 = vpop.f32.mrf.mxu0 }
 0xbf9   : > { %v1468_v0 = vsel %vm2815_vm6, %v1466_v21, -1e+30 }
 0xbfa   : > { %v1469_v22 = vsel %vm607_vm5, %v1468_v0, -inf }
 0xbfb   : > { %1470 = vmax.xlane.f32.xlu2 %v1469_v22 }
 0xbfe   : > { %v1545_v25 = vpop.f32.mrf.mxu2 }
 0xbff   : > { %v1571_v26 = vadd.f32 %v1570_v24, %v1545_v25 }
 0xc01   : > { %v1573_v27 = vsel %vm2815_vm6, %v1571_v26, -1e+30 }
 0xc02   : > { %v1574_v28 = vsel %vm607_vm5, %v1573_v27, -inf }
 0xc03   : > { %1575 = vmax.xlane.f32.xlu1 %v1574_v28 }
 0xc13   : > { %1809 = vrot.lane.b32.xlu2 %v1807_v34, %s3479_s27 }
 0xc1b   : > { %1688 = vrot.lane.b32.xlu2 %v1667_v46, %s3484_s24  ;;  %s455_s24 = sand.u32 1, %s2525_s26  }
 0xc1c   : > { %1718 = vrot.lane.b32.xlu1 %v1660_v47, %s3485_s15  ;;  %s456_s0 = scalar_lea.vmem [#allocation2], %s455_s24  ;;  %s2145_s27 = scalar_lea.sflag [#allocation3], %s455_s24 }
 0xc23   : > { %1685 = vrot.lane.b32.xlu2 %v1683_v50, %s3486_s16 }
 0xc2b   : > { %1715 = vrot.lane.b32.xlu2 %v1675_v2, %s3487_s23  ;;  %s2153_s23 = scalar_lea.hbm %s3437_s13, %s2643_s29 }
 0xc2c   : > { %s2157_s1 = sshll.u32 %s2153_s23, 4  ;;  %s2158_s1 = int_to_ptr.hbm [resolvable:$true] %s2157_s1 }
 0xc2d   : > { %s2485_s17 = sshra.s32 %s2158_s1, 4  ;;  %s2486_s17 = int_to_ptr.hbm [resolvable:$true] %s2485_s17 }
 0xc2e   : > { %s2487_s14 = scalar_lea.hbm %s2486_s17, 1  ;;  %p2492_p0 = scmp.lt.s32.totalorder %s2486_s17, %s3437_s13 }
 0xc2f   : > { %p2488_p11 = scmp.ne.s32.totalorder %s2486_s17, %s2487_s14 }
 0xc31   : > { %p2489_p12 = pnand %p2488_p11, %p2660_p5 }
 0xc33   : > { %p2490_p13 = pneg %p2489_p12 }
 0xc6e   : > { %v1471_v56 = vpop.xlane.xlu2 %1470 }
 0xc6f   : > { %v1472_v53 = vsub.f32 %v1468_v0, %v1471_v56 }
 0xc71   : > { %v1473_v54 = vmul.f32 1.442695, %v1472_v53 }
 0xc73   : > { %2444 = vpow2.f32 %v1473_v54  ;;  %v2286_v54 = vld [vmem:[%s3430_s6 + $0x60] sm:$0xff] }
 0xc76   : > { %v1576_v63 = vpop.xlane.xlu1 %1575  ;;  %v1810_v62 = vpop.permute.xlu2 %1809 }
 0xc77   : > { %v1577_v55 = vsub.f32 %v1573_v27, %v1576_v63  ;;  %v1812_v60 = vsub.f32 %v1806_v59, %v1810_v62  ;;  %v2289_v63 = vld [vmem:[%s3430_s6 + $0x78] sm:$0xff]  ;;  %v2288_v62 = vld [vmem:[%s3430_s6 + $0x70] sm:$0xff] }
 0xc79   : > { %v2445_v57 = vpop.eup %2444  ;;  %v1578_v37 = vmul.f32 1.442695, %v1577_v55  ;;  %v1813_v61 = vmul.f32 0.25, %v1812_v60 }
 0xc7a   : > { %v1475_v58 = vsel %vm607_vm5, %v2445_v57, 0.0 }
 0xc7b   : > { %2446 = vpow2.f32 %v1578_v37  ;;  %1476 = vadd.xlane.f32.xlu0 %v1475_v58 }
 0xc7e   : > { %v1689_v12 = vpop.permute.xlu2 %1688 }
 0xc7f   : > { %2302 = vmatpush.xpose.msk.msrb.mxu3 %vm607_vm5, %v1689_v12 }
 0xc81   : > { %v2447_v43 = vpop.eup %2446 }
 0xc82   : > { %v1580_v52 = vsel %vm607_vm5, %v2447_v43, 0.0 }
 0xc83   : > { %2308 = vmatpush.xpose.msk.msra.mxu3 %vm607_vm5, %v1689_v12  ;;  %1581 = vadd.xlane.f32.xlu1 %v1580_v52 }
 0xc86   : > { %v1686_v36 = vpop.permute.xlu2 %1685 }
 0xc87   : > { %2303 = vmatmul.msk.f32.vlgmr.msrb.gmra.mxu3 %vm607_vm5, %v1686_v36 }
 0xc88   : > { %1983 = vmatpush.msrb.mxu3 %v2329_v6 }
 0xc8e   : > { %v1719_v17 = vpop.permute.xlu1 %1718  ;;  %v1716_v9 = vpop.permute.xlu2 %1715 }
 0xc8f   : > { %1848 = vrot.lane.b32.xlu0 %v1813_v61, %s3488_s22 }
 0xc9c   : > { %1823 = vrot.lane.b32.xlu1 %v1821_v11, %s3477_s20  ;;  %v2328_v11 = vld [vmem:[%s3432_s8 + $0xe8] sm:$0xff]  ;;  %s2155_s20 = sshll.u32 %s456_s0, 4  ;;  %s2156_s20 = int_to_ptr.vmem [resolvable:$true] %s2155_s20 }
 0xcee   : > { %v1477_v45 = vpop.xlane.xlu0 %1476 }
 0xcef   : > { %2448 = vrcp.f32 %v1477_v45  ;;  %v2326_v45 = vld [vmem:[%s3432_s8 + $0xd8] sm:$0xff] }
 0xcf5   : > { %v2449_v7 = vpop.eup %2448 }
 0xcf6   : > { %v1479_v29 = vmul.f32 %v2449_v7, %v2445_v57  ;;  %v1582_v8 = vpop.xlane.xlu1 %1581  ;;  %v2324_v7 = vld [vmem:[%s3432_s8 + $0xc8] sm:$0xff] }
 0xcf7   : > { %2450 = vrcp.f32 %v1582_v8  ;;  %v2322_v8 = vld [vmem:[%s3432_s8 + $0xb8] sm:$0xff] }
 0xcf8   : > { %2294 = vmatmul.msk.f32.vlgmr.msra.gmra.mxu1 %vm607_vm5, %v1479_v29  ;;  %v2321_v29 = vld [vmem:[%s3432_s8 + $0xb0] sm:$0xff] }
 0xcf9   : > { %2304 = vmatpush.xpose.msk.msra.mxu1 %vm607_vm5, %v1719_v17 }
 0xcfd   : > { %v2451_v1 = vpop.eup %2450 }
 0xcfe   : > { %v1584_v31 = vmul.f32 %v2451_v1, %v2447_v43  ;;  %v2319_v1 = vld [vmem:[%s3432_s8 + $0xa0] sm:$0xff] }
 0xd00   : > { %2299 = vmatmul.msk.f32.vlgmr.msrb.gmra.mxu1 %vm607_vm5, %v1584_v31  ;;  %v2320_v31 = vld [vmem:[%s3432_s8 + $0xa8] sm:$0xff] }
 0xd01   : > { %2310 = vmatpush.xpose.msk.msrb.mxu1 %vm607_vm5, %v1719_v17  ;;  %v1849_v32 = vpop.permute.xlu0 %1848  ;;  %v2325_v17 = vld [vmem:[%s3432_s8 + $0xd0] sm:$0xff] }
 0xd08   : > { %2305 = vmatmul.msk.f32.vlgmr.msra.gmra.mxu1 %vm607_vm5, %v1716_v9  ;;  %v2317_v9 = vld [vmem:[%s3432_s8 + $0x90] sm:$0xff] }
 0xd09   : > { %2003 = vmatpush.msra.mxu1 %v2330_v44 }
 0xd0a   : > { %v1711_v20 = vpop.f32.mrf.mxu3 }
 0xd0b   : > { %2004 = vmatpush.msra.mxu1 %v2328_v11 }
 0xd0d   : > { %2005 = vmatpush.msra.mxu1 %v2326_v45  ;;  %v2117_v45 = vld [vmem:[%s3435_s11 + $0x38] sm:$0xff] }
 0xd0e   : > { %v1824_v10 = vpop.permute.xlu1 %1823 }
 0xd0f   : > { %2309 = vmatmul.msk.f32.vlgmr.msra.gmra.mxu3 %vm607_vm5, %v1824_v10  ;;  %2006 = vmatpush.msra.mxu1 %v2324_v7  ;;  %v2318_v10 = vld [vmem:[%s3432_s8 + $0x98] sm:$0xff] }
 0xd10   : > { %2311 = vmatmul.msk.f32.vlgmr.msrb.gmra.mxu1 %vm607_vm5, %v1849_v32  ;;  %v2315_v32 = vld [vmem:[%s3432_s8 + $0x80] sm:$0xff] }
 0xd11   : > { %2007 = vmatpush.msra.mxu1 %v2322_v8  ;;  %v2114_v8 = vld [vmem:[%s3435_s11 + $0x20] sm:$0xff] }
 0xd13   : > { %2008 = vmatpush.msra.mxu1 %v2320_v31  ;;  %v2111_v31 = vld [vmem:[%s3435_s11 + $0x8] sm:$0xff] }
 0xd15   : > { %2009 = vmatpush.msra.mxu1 %v2318_v10 }
 0xd17   : > { %2010 = vmatpush.msra.mxu1 %v2316_v48  ;;  %v2551_v48 = vmov 8.0  }
 0xd75   : > { %v1504_v16 = vpop.f32.mrf.mxu1 }
 0xd76   : > { %2301 = vmatmul.msk.f32.vlgmr.msra.gmra.mxu0 %vm812_vm7, %v1504_v16 }
 0xd7d   : > { %v1605_v18 = vpop.f32.mrf.mxu1 }
 0xd7e   : > { %2300 = vmatmul.msk.f32.vlgmr.msra.gmra.mxu2 %vm812_vm7, %v1605_v18 }
 0xd85   : > { %v1741_v21 = vpop.f32.mrf.mxu1 }
 0xd86   : > { %v1742_v0 = vadd.f32 %v1741_v21, %v1711_v20 }
 0xd88   : > { %v1744_v22 = vsel %vm2815_vm6, %v1742_v0, -1e+30 }
 0xd89   : > { %v1745_v24 = vsel %vm607_vm5, %v1744_v22, -inf }
 0xd8a   : > { %1746 = vmax.xlane.f32.xlu2 %v1745_v24 }
 0xd8d   : > { %v1869_v25 = vpop.f32.mrf.mxu1 }
 0xd92   : > { %v1844_v26 = vpop.f32.mrf.mxu3 }
 0xd93   : > { %v1870_v27 = vadd.f32 %v1869_v25, %v1844_v26  ;;  %v2414_v25 = vld [vmem:[%s3431_s7 + $0x1] ss:$0 sm:$0xff] }
 0xd95   : > { %v1872_v28 = vsel %vm2815_vm6, %v1870_v27, -1e+30 }
 0xd96   : > { %v1873_v30 = vsel %vm607_vm5, %v1872_v28, -inf }
 0xd97   : > { %1874 = vmax.xlane.f32.xlu1 %v1873_v30  ;;  %v2349_v30 = vld [vmem:[%s3433_s9 + $0xf8] sm:$0xff] }
 0xdb0   : > { %1756 = vrot.lane.b32.xlu1 %v3107_v39, %s3478_s2  ;;  %v2287_v39 = vld [vmem:[%s3430_s6 + $0x68] sm:$0xff]  ;;  %s2491_s2 = scalar_lea.hbm %s3437_s13, 2 }
 0xdb1   : > { %1799 = vmatpush.msrb.mxu0 %v2287_v39  ;;  %v2337_v39 = vld [vmem:[%s3433_s9 + $0x98] sm:$0xff]  ;;  %p2493_p1 = scmp.lt.s32.totalorder %s2491_s2, %s2487_s14 }
 0xdb3   : > { %1800 = vmatpush.msrb.mxu0 %v2286_v54  ;;  %p2494_p2 = por %p2493_p1, %p2492_p0 }
 0xdb5   : > { %1924 = vmatpush.msra.mxu0 %v2289_v63  ;;  %p2495_p3 = pnand %p2494_p2, %p2490_p13 }
 0xdb7   : > { %1925 = vmatpush.msra.mxu0 %v2288_v62 }
 0xdf3   : > { %v1651_v58 = vpop.f32.mrf.mxu0 }
 0xdfd   : > { %v1747_v33 = vpop.xlane.xlu2 %1746 }
 0xdfe   : > { %v1748_v34 = vsub.f32 %v1744_v22, %v1747_v33  ;;  %v2348_v33 = vld [vmem:[%s3433_s9 + $0xf0] sm:$0xff] }
 0xe00   : > { %v1749_v40 = vmul.f32 1.442695, %v1748_v34  ;;  %v2347_v34 = vld [vmem:[%s3433_s9 + $0xe8] sm:$0xff] }
 0xe01   : > { %v1628_v55 = vpop.f32.mrf.mxu2 }
 0xe02   : > { %2452 = vpow2.f32 %v1749_v40  ;;  %v1652_v43 = vadd.f32 %v1651_v58, %v1628_v55  ;;  %v2346_v40 = vld [vmem:[%s3433_s9 + $0xe0] sm:$0xff] }
 0xe08   : > { %v2453_v41 = vpop.eup %2452 }
 0xe09   : > { %v1751_v42 = vsel %vm607_vm5, %v2453_v41, 0.0 }
 0xe0a   : > { %v1875_v46 = vpop.xlane.xlu1 %1874  ;;  %1752 = vadd.xlane.f32.xlu0 %v1751_v42  ;;  %v2344_v42 = vld [vmem:[%s3433_s9 + $0xd0] sm:$0xff] }
 0xe0b   : > { %v1876_v47 = vsub.f32 %v1872_v28, %v1875_v46  ;;  %v2343_v46 = vld [vmem:[%s3433_s9 + $0xc8] sm:$0xff] }
 0xe0d   : > { %v1877_v3 = vmul.f32 1.442695, %v1876_v47  ;;  %v2342_v47 = vld [vmem:[%s3433_s9 + $0xc0] sm:$0xff] }
 0xe0f   : > { %2454 = vpow2.f32 %v1877_v3  ;;  %v2341_v3 = vld [vmem:[%s3433_s9 + $0xb8] sm:$0xff] }
 0xe15   : > { %v2455_v23 = vpop.eup %2454 }
 0xe16   : > { %v1879_v35 = vsel %vm607_vm5, %v2455_v23, 0.0 }
 0xe17   : > { %1880 = vadd.xlane.f32.xlu2 %v1879_v35  ;;  %v2339_v35 = vld [vmem:[%s3433_s9 + $0xa8] sm:$0xff] }
 0xe22   : > { %v1757_v50 = vpop.permute.xlu1 %1756 }
 0xe23   : > { %1777 = vmatpush.msrb.mxu2 %v1757_v50 }
 0xe25   : > { %1902 = vmatpush.msra.mxu2 %v1757_v50  ;;  %v2338_v50 = vld [vmem:[%s3433_s9 + $0xa0] sm:$0xff] }
 0xe7d   : > { %v1753_v38 = vpop.xlane.xlu0 %1752 }
 0xe7e   : > { %2456 = vrcp.f32 %v1753_v38  ;;  %v2336_v38 = vld [vmem:[%s3433_s9 + $0x90] sm:$0xff] }
 0xe84   : > { %v2457_v49 = vpop.eup %2456 }
 0xe85   : > { %v1755_v51 = vmul.f32 %v2457_v49, %v2453_v41  ;;  %v2345_v41 = vld [vmem:[%s3433_s9 + $0xd8] sm:$0xff] }
 0xe87   : > { %2306 = vmatmul.msk.f32.vlgmr.msrb.gmra.mxu2 %vm607_vm5, %v1755_v51 }
 0xe88   : > { %2053 = vmatpush.msrb.mxu2 %v2349_v30 }
 0xe8a   : > { %v1881_v2 = vpop.xlane.xlu2 %1880  ;;  %2054 = vmatpush.msrb.mxu2 %v2348_v33 }
 0xe8b   : > { %2458 = vrcp.f32 %v1881_v2  ;;  %v2335_v2 = vld [vmem:[%s3433_s9 + $0x88] sm:$0xff] }
 0xe8c   : > { %2055 = vmatpush.msrb.mxu2 %v2347_v34 }
 0xe8e   : > { %2056 = vmatpush.msrb.mxu2 %v2346_v40 }
 0xe90   : > { %2057 = vmatpush.msrb.mxu2 %v2345_v41 }
 0xe91   : > { %v2459_v56 = vpop.eup %2458 }
 0xe92   : > { %v1883_v53 = vmul.f32 %v2459_v56, %v2455_v23  ;;  %2058 = vmatpush.msrb.mxu2 %v2344_v42  ;;  %v2340_v23 = vld [vmem:[%s3433_s9 + $0xb0] sm:$0xff]  ;;  %v2334_v56 = vld [vmem:[%s3433_s9 + $0x80] sm:$0xff] }
 0xe94   : > { %2312 = vmatmul.msk.f32.vlgmr.msra.gmra.mxu2 %vm607_vm5, %v1883_v53 }
 0xe95   : > { %2059 = vmatpush.msrb.mxu2 %v2343_v46 }
 0xe97   : > { %2060 = vmatpush.msrb.mxu2 %v2342_v47 }
 0xe99   : > { %2061 = vmatpush.msrb.mxu2 %v2341_v3 }
 0xe9b   : > { %2062 = vmatpush.msrb.mxu2 %v2340_v23  ;;  %v2118_v23 = vld [vmem:[%s3436_s12] sm:$0x1] }
 0xe9d   : > { %2063 = vmatpush.msrb.mxu2 %v2339_v35 }
 0xe9f   : > { %2064 = vmatpush.msrb.mxu2 %v2338_v50 }
 0xea1   : > { %2065 = vmatpush.msrb.mxu2 %v2337_v39 }
 0xea3   : > { %2066 = vmatpush.msrb.mxu2 %v2336_v38 }
 0xea5   : > { %2067 = vmatpush.msrb.mxu2 %v2335_v2 }
 0xea7   : > { %2068 = vmatpush.msrb.mxu2 %v2334_v56 }
 0xf0a   : > { %v1779_v57 = vpop.f32.mrf.mxu2 }
 0xf0b   : > { %2307 = vmatmul.msk.f32.vlgmr.msrb.gmra.mxu0 %vm812_vm7, %v1779_v57 }
 0xf0c   : > { %2130 = vmatpush.msrb.mxu0 %v2117_v45 }
 0xf17   : > { %v1904_v37 = vpop.f32.mrf.mxu2 }
 0xf18   : > { %2313 = vmatmul.msk.f32.vlgmr.msra.gmra.mxu0 %vm812_vm7, %v1904_v37 }
 0xf88   : > { %v1802_v12 = vpop.f32.mrf.mxu0 }
 0xf89   : > { %v1805_v52 = vadd.f32 %v1802_v12, %v1652_v43 }
 0xf95   : > { %v1927_v36 = vpop.f32.mrf.mxu0 }
 0xf96   : > { %v1930_v59 = vadd.f32 %v1927_v36, %v1805_v52 }
 0xf98   : > { %v3249_v60 = vadd.f32 %v1930_v59, %v3069_v4  ;;  %v2327_v4 = vld [vmem:[%s3432_s8 + $0xe0] sm:$0xff] }
 0xf99   : > { %1984 = vmatpush.msrb.mxu3 %v2327_v4 }
 0xf9a   : > { %v1934_v61 = vmul.f32 %v3249_v60, %v3249_v60 }
 0xf9b   : > { %1985 = vmatpush.msrb.mxu3 %v2325_v17 }
 0xf9c   : > { %v1935_v5 = vsel %vm480_vm0, %v1934_v61, 0.0 }
 0xf9d   : > { %1936 = vadd.xlane.f32.xlu2 %v1935_v5  ;;  %1986 = vmatpush.msrb.mxu3 %v2323_v15  ;;  %v2116_v15 = vld [vmem:[%s3435_s11 + $0x30] sm:$0xff] }
 0xf9e   : > { %2131 = vmatpush.msrb.mxu0 %v2116_v15 }
 0xf9f   : > { %1987 = vmatpush.msrb.mxu3 %v2321_v29 }
 0xfa1   : > { %1988 = vmatpush.msrb.mxu3 %v2319_v1  ;;  %v2113_v1 = vld [vmem:[%s3435_s11 + $0x18] sm:$0xff] }
 0xfa3   : > { %1989 = vmatpush.msrb.mxu3 %v2317_v9 }
 0xfa5   : > { %1990 = vmatpush.msrb.mxu3 %v2315_v32  ;;  %v2110_v32 = vld [vmem:[%s3435_s11] sm:$0xff] }
0x1010   : > { %v1937_v13 = vpop.xlane.xlu2 %1936 }
0x1011   : > { %v1938_v14 = vmul.f32 %v1937_v13, %v2729_v19 }
0x1013   : > { %v1939_v16 = vadd.f32 1e-06, %v1938_v14 }
0x1015   : > { %2460 = vrsqrt.f32 %v1939_v16  ;;  %vm1946_vm4 = vweird.f32 %v1939_v16 }
0x101b   : > { %v2461_v18 = vpop.eup %2460 }
0x101c   : > { %v1941_v20 = vmul.f32 %v2461_v18, %v1939_v16  ;;  %vm1947_vm3 = vweird.f32 %v2461_v18 }
0x101d   : > { %vm1948_vm5 = vmor %vm1946_vm4, %vm1947_vm3 }
0x101e   : > { %v1942_v21 = vmul.f32 %v2461_v18, %v1941_v20 }
0x1020   : > { %v1943_v0 = vmul.f32 0.5, %v1942_v21  ;;  %v2415_v21 = vld [vmem:[%s3434_s10] ss:$0 sm:$0xff] }
0x1022   : > { %v1944_v22 = vsub.f32 1.5, %v1943_v0 }
0x1024   : > { %v1945_v24 = vmul.f32 %v2461_v18, %v1944_v22 }
0x1026   : > { %v1949_v26 = vsel %vm1948_vm5, %v2461_v18, %v1945_v24 }
0x1027   : > { %v1950_v27 = vmul.f32 %v1949_v26, %v3249_v60 }
0x1029   : > { %v1954_v28 = vmul.f32 %v2414_v25, %v1950_v27 }
0x102b   : > { %2331 = vmatmul.msk.f32.vlgmr.msrb.gmra.mxu3 %vm480_vm0, %v1954_v28  ;;  %2332 = vmatmul.msk.f32.vlgmr.msra.gmra.mxu1 %vm480_vm0, %v1954_v28 }
0x10a8   : > { %v2012_v61 = vpop.f32.mrf.mxu1 }
0x10ae   : > { %v1992_v49 = vpop.f32.mrf.mxu3 }
0x10af   : > { %v2333_v51 = vmul.f32 -1.442695, %v1992_v49 }
0x10b1   : > { %2462 = vpow2.f32 %v2333_v51 }
0x10b7   : > { %v2463_v53 = vpop.eup %2462 }
0x10b8   : > { %v2018_v54 = vadd.f32 1.0, %v2463_v53 }
0x10ba   : > { %2464 = vrcp.f32 %v2018_v54  ;;  %v2030_v57 = vand.u32 2147483648, %v2018_v54  ;;  %v2028_v58 = vand.u32 2147483647, %v2018_v54  ;;  %vm2024_vm7 = vweird.f32 %v2018_v54 }
0x10bc   : > { %v2031_v43 = vor.u32 1.1754944e-38, %v2030_v57  ;;  %vm2029_vm9 = vcmp.eq.f32.partialorder %v2028_v58, 8.507059e+37 }
0x10c0   : > { %v2465_v63 = vpop.eup %2464 }
0x10c1   : > { %v2020_v62 = vmul.f32 %v2465_v63, %v2018_v54  ;;  %vm2025_vm6 = vweird.f32 %v2465_v63 }
0x10c2   : > { %vm2026_vm8 = vmor %vm2024_vm7, %vm2025_vm6 }
0x10c3   : > { %v2021_v55 = vsub.f32 1.0, %v2020_v62 }
0x10c5   : > { %v2022_v37 = vmul.f32 %v2465_v63, %v2021_v55 }
0x10c7   : > { %v2023_v12 = vadd.f32 %v2465_v63, %v2022_v37 }
0x10c9   : > { %v2027_v52 = vsel %vm2026_vm8, %v2465_v63, %v2023_v12 }
0x10ca   : > { %v2032_v36 = vsel %vm2029_vm9, %v2031_v43, %v2027_v52 }
0x10cb   : > { %v2034_v59 = vmul.f32 %v2032_v36, %v1992_v49 }
0x10cd   : > { %v2035_v5 = vmul.f32 %v2034_v59, %v2012_v61 }
0x10cf   : > { %2069 = vmatmul.f32.vlgmr.msrb.gmra.mxu2 %v2035_v5 }
0x1152   : > { %v2070_v6 = vpop.f32.mrf.mxu2 }
0x1153   : > { %v2071_v44 = vadd.f32 %v2070_v6, %v3249_v60  ;;  %v2115_v60 = vld [vmem:[%s3435_s11 + $0x28] sm:$0xff] }
0x1154   : > { %2132 = vmatpush.msrb.mxu0 %v2115_v60 }
0x1155   : > { %v2074_v4 = vmul.f32 %v2071_v44, %v2071_v44 }
0x1156   : > { %2133 = vmatpush.msrb.mxu0 %v2114_v8 }
0x1157   : > { %v2075_v11 = vsel %vm480_vm0, %v2074_v4, 0.0 }
0x1158   : > { %2076 = vadd.xlane.f32.xlu2 %v2075_v11  ;;  %2134 = vmatpush.msrb.mxu0 %v2113_v1 }
0x11cb   : > { %v2077_v17 = vpop.xlane.xlu2 %2076 }
0x11cc   : > { %v2078_v7 = vmul.f32 %v2077_v17, %v2729_v19  ;;  %v2112_v19 = vld [vmem:[%s3435_s11 + $0x10] sm:$0xff] }
0x11cd   : > { %2135 = vmatpush.msrb.mxu0 %v2112_v19 }
0x11ce   : > { %v2079_v29 = vadd.f32 1e-06, %v2078_v7 }
0x11cf   : > { %2136 = vmatpush.msrb.mxu0 %v2111_v31 }
0x11d0   : > { %2466 = vrsqrt.f32 %v2079_v29  ;;  %vm2086_vm11 = vweird.f32 %v2079_v29 }
0x11d1   : > { %2468 = vrcp.f32 %v2551_v48  ;;  %2137 = vmatpush.msrb.mxu0 %v2110_v32 }
0x11d6   : > { %v2467_v9 = vpop.eup %2466 }
0x11d7   : > { %v2081_v10 = vmul.f32 %v2467_v9, %v2079_v29  ;;  %v2469_v16 = vpop.eup %2468  ;;  %vm2087_vm10 = vweird.f32 %v2467_v9 }
0x11d8   : > { %vm2088_vm12 = vmor %vm2086_vm11, %vm2087_vm10  ;;  %v2103_v0 = vmul.f32 8.0, %v2469_v16  ;;  %vm2107_vm13 = vweird.f32 %v2469_v16 }
0x11d9   : > { %v2082_v13 = vmul.f32 %v2467_v9, %v2081_v10 }
0x11da   : > { %v2104_v26 = vsub.f32 1.0, %v2103_v0 }
0x11db   : > { %v2083_v14 = vmul.f32 0.5, %v2082_v13 }
0x11dc   : > { %v2105_v30 = vmul.f32 %v2469_v16, %v2104_v26 }
0x11dd   : > { %v2084_v18 = vsub.f32 1.5, %v2083_v14 }
0x11de   : > { %v2106_v40 = vadd.f32 %v2469_v16, %v2105_v30 }
0x11df   : > { %v2085_v20 = vmul.f32 %v2467_v9, %v2084_v18 }
0x11e0   : > { %v2108_v46 = vsel %vm2107_vm13, %v2469_v16, %v2106_v40 }
0x11e1   : > { %v2089_v22 = vsel %vm2088_vm12, %v2467_v9, %v2085_v20 }
0x11e2   : > { %v2090_v24 = vmul.f32 %v2089_v22, %v2071_v44 }
0x11e4   : > { %v2094_v25 = vmul.f32 %v2415_v21, %v2090_v24 }
0x11e6   : > { %v2095_v27 = vsel %vm480_vm0, %v2094_v25, 0.0 }
0x11e7   : > { %v2096_v28 = vrot.slane %v2095_v27, 4 }
0x11e9   : > { %v2097_v33 = vadd.f32 %v2096_v28, %v2095_v27 }
0x11eb   : > { %v2098_v34 = vrot.slane %v2097_v33, 2 }
0x11ed   : > { %v2099_v41 = vadd.f32 %v2098_v34, %v2097_v33 }
0x11ef   : > { %v2100_v42 = vrot.slane %v2099_v41, 1 }
0x11f1   : > { %v2101_v47 = vadd.f32 %v2100_v42, %v2099_v41 }
0x11f3   : > { %v2109_v3 = vmul.f32 %v2108_v46, %v2101_v47 }
0x11f5   : > { %2350 = vmatmul.msk.f32.vlgmr.msrb.gmra.mxu0 %vm480_vm0, %v2109_v3 }
0x1272   : > { %v2139_v35 = vpop.f32.mrf.mxu0 }
0x1273   : > { %v2140_v50 = vadd.f32 %v2139_v35, %v2118_v23 }
0x1275   : > { %2143 = vst.msk [vmem:[%s456_s0] sm:$0x1] %vm2142_vm14, %v2140_v50 }
0x1276   : > { %2498 = shalt.err (!%p2495_p3)
}
0x1277   : > { %2353 = dma.vmem_to_hbm [thread:$0]  (%p2660_p5), %s2156_s20, 16, %s2158_s1, %s2145_s27  }
0x1278 PF: > { %p2359_p4 = scmp.ge.s32.totalorder %s2533_s28, 2  ;;  %s2169_s16 = sand.u32 1, %s2521_s25  }
0x1279   : > { %s2170_s23 = scalar_lea.sflag [#allocation3], %s2169_s16 }
0x127a   : > { %p2356_p7 = pnand %p2359_p4, %p2664_p6 }
0x127c   : > { %p2357_p8 = pneg %p2356_p7 }
0x127e   : > { %2516 = dma.done.wait (%p2357_p8), %s2170_s23, 16  }
0x127f   : > { %2518 = vsyncadd (%p2357_p8), %s2170_s23, 4294967280  ;;  %s3490_s28 = sld [smem:[#allocation6_spill]]  ;;  %s3493_s25 = smov %s2525_s26 }
0x1280   : > { %s3491_s22 = sld [smem:[#allocation5_spill]] }
0x1281   : > { %s3492_s27 = sld [smem:[#allocation7_spill]] }
0x1285   : > { %p23_p9 = scmp.ge.s32.totalorder %s3490_s28, 4  }
0x1286   : > { %s3494_s26 = smov %s3491_s22 }
0x1287   :  { %25 = sbr.rel (!%p23_p9) target bundleno = 7 (0x7), region = 120 }
0x128c   :  { %2175 = vsyncpa [#allocation3], 1 }
0x128d   :  { %2177 = vsyncpa [#allocation3 + $0x1], 1 }

</bundles_post_ra>
